<compile_context>
chip_gen: v5e
topology: v5e:2x2
jax: 0.10.0
libtpu: 0.0.40
codegen_flags: <defaults>
</compile_context>

<pallas_src>
import functools

import jax
import jax.numpy as jnp
from jax import lax
from jax.experimental import pallas as pl
from jax.experimental.pallas import tpu as pltpu

EPS = 1e-5  # torch layer_norm default eps


def _vmem_caps():
    """Generation-gated (vmem_limit_bytes, working_budget_bytes)."""
    try:
        cap = int(pltpu.get_tpu_info().vmem_capacity_bytes)
    except Exception:
        cap = 64 * 1024 * 1024  # conservative (v7x-sized) fallback
    # Leave headroom for Mosaic scratch; cap at 96 MiB on the 128 MiB parts
    # (v5e/v6e), ~48 MiB on v7x (64 MiB physical per TensorCore).
    limit = min((cap * 3) // 4, 96 * 1024 * 1024)
    budget = limit // 2  # working-set target used for tile / fusion decisions
    return limit, budget


def _pick_time_tile(F, T, budget_bytes, max_tt=None):
    """Largest lane-dense time tile: full extent first, then big divisors.

    Working set per (F, tt) f32 tile in the apply pass: ~3 buffered input
    copies + 2 buffered output copies.
    """
    per_col = (3 + 2) * F * 4
    cands = [T] + [tt for tt in (4096, 2048, 1024, 512, 256, 128)
                   if tt < T and T % tt == 0]
    if max_tt is not None:
        cands = [c for c in cands if c <= max_tt] or [128]
    for tt in cands:
        if tt * per_col <= budget_bytes:
            return tt
    return 128  # caller pads T to a multiple of 128


# ----------------------------------------------------------------------------
# Fused path: whole tensor resident in VMEM (one launch, one HBM sweep).
# ----------------------------------------------------------------------------
def _fused_kernel(x_ref, w1t_ref, b1_ref, w2t_ref, b2_ref, o_ref):
    x = x_ref[...].astype(jnp.float32)                     # (B, F, T)
    n = x.size
    mean = jnp.sum(x) * (1.0 / n)
    xc = x - mean
    var = jnp.sum(xc * xc) * (1.0 / n)                     # centered: no cancellation
    rstd = lax.rsqrt(var + EPS)
    xn = xc * rstd                                         # f32 on the VPU

    b1v = b1_ref[...]                                      # (H, 1) f32, loaded once
    b2v = b2_ref[...]                                      # (F, 1) f32
    for b in range(x.shape[0]):                            # B is static & small
        h = jnp.dot(w1t_ref[...], xn[b].astype(jnp.bfloat16),
                    preferred_element_type=jnp.float32)    # (H, T)
        h = jnp.maximum(h + b1v, 0.0)
        logits = jnp.dot(w2t_ref[...], h.astype(jnp.bfloat16),
                         preferred_element_type=jnp.float32)   # (F, T)
        o_ref[b] = jax.nn.sigmoid(logits + b2v).astype(o_ref.dtype)


# ----------------------------------------------------------------------------
# Two-pass path (large tensors): pass A = global sum / sum-of-squares.
# ----------------------------------------------------------------------------
def _stats_kernel(x_ref, stat_ref, sum_sc, ssq_sc):
    t = pl.program_id(1)

    @pl.when(t == 0)
    def _():
        sum_sc[...] = jnp.zeros_like(sum_sc)
        ssq_sc[...] = jnp.zeros_like(ssq_sc)

    x = x_ref[0].astype(jnp.float32)                       # (F, tt)
    sum_sc[...] += jnp.sum(x, axis=0, keepdims=True)       # (1, tt)
    ssq_sc[...] += jnp.sum(x * x, axis=0, keepdims=True)   # (1, tt)

    @pl.when(t == pl.num_programs(1) - 1)
    def _():
        # Lane-reduce to scalars and replicate across the lane so the output
        # is a tiny lane-dense (2, 128) slab per batch (no XLA glue later).
        stat_ref[0, 0:1, :] = jnp.full((1, 128), jnp.sum(sum_sc[...]),
                                       dtype=jnp.float32)
        stat_ref[0, 1:2, :] = jnp.full((1, 128), jnp.sum(ssq_sc[...]),
                                       dtype=jnp.float32)


# ----------------------------------------------------------------------------
# Two-pass path: pass B = combine stats, normalize + mask head per tile.
# ----------------------------------------------------------------------------
def _apply_kernel(inv_n, stats_ref, x_ref, w1t_ref, b1_ref, w2t_ref, b2_ref,
                  o_ref):
    s = stats_ref[...]                                     # (B, 2, 128), resident
    # All 128 lanes of each stat are identical -> divide the lane-sum by 128.
    mean = jnp.sum(s[:, 0, :]) * (inv_n / 128.0)
    msq = jnp.sum(s[:, 1, :]) * (inv_n / 128.0)
    var = jnp.maximum(msq - mean * mean, 0.0)
    rstd = lax.rsqrt(var + EPS)

    x = x_ref[0].astype(jnp.float32)                       # (F, tt)
    x_n = (x - mean) * rstd

    h = jnp.dot(w1t_ref[...], x_n.astype(jnp.bfloat16),
                preferred_element_type=jnp.float32)        # (H, tt)
    h = jnp.maximum(h + b1_ref[...], 0.0)                  # f32 bias + relu
    logits = jnp.dot(w2t_ref[...], h.astype(jnp.bfloat16),
                     preferred_element_type=jnp.float32)   # (F, tt)
    o_ref[0] = jax.nn.sigmoid(logits + b2_ref[...]).astype(o_ref.dtype)


def _x_tile_spec(F, tt, buffered):
    idx = lambda b, t: (b, 0, t)
    if buffered and hasattr(pl, "Buffered"):
        try:
            # Deeper pipelining: per-step compute is tiny, so hide DMA latency.
            return pl.BlockSpec((1, F, tt), idx, pipeline_mode=pl.Buffered(3))
        except TypeError:  # BlockSpec without pipeline_mode on this version
            pass
    return pl.BlockSpec((1, F, tt), idx)


def plain_model_forward(tf_rep, w1, b1, w2, b2, *, out_dtype=jnp.float32,
                        force_two_pass=False, max_time_tile=None):
    """tf_rep: (B, F, T) -> mask (B, F, T)."""
    B, F, T = tf_rep.shape
    H = w1.shape[1]
    limit, budget = _vmem_caps()

    # Tiny weights: pre-transpose once, bf16 at the MXU boundary, f32 biases.
    w1t = w1.T.astype(jnp.bfloat16)                        # (H, F)
    w2t = w2.T.astype(jnp.bfloat16)                        # (F, H)
    b1c = b1.reshape(H, 1).astype(jnp.float32)
    b2c = b2.reshape(F, 1).astype(jnp.float32)

    x_bytes = B * F * T * 4
    w_bytes = 2 * H * F * 2 + (H + F) * 4

    # ---------- fused single-launch path (one HBM read + one HBM write) ----
    if not force_two_pass and 6 * x_bytes + w_bytes <= budget:
        return pl.pallas_call(
            _fused_kernel,
            out_shape=jax.ShapeDtypeStruct((B, F, T), out_dtype),
            grid_spec=pltpu.PrefetchScalarGridSpec(
                num_scalar_prefetch=0,
                grid=(1,),
                in_specs=[
                    pl.BlockSpec((B, F, T), lambda i: (0, 0, 0)),
                    pl.BlockSpec((H, F), lambda i: (0, 0)),
                    pl.BlockSpec((H, 1), lambda i: (0, 0)),
                    pl.BlockSpec((F, H), lambda i: (0, 0)),
                    pl.BlockSpec((F, 1), lambda i: (0, 0)),
                ],
                out_specs=pl.BlockSpec((B, F, T), lambda i: (0, 0, 0))),
            compiler_params=pltpu.CompilerParams(
                dimension_semantics=("arbitrary",),
                vmem_limit_bytes=limit),
        )(tf_rep, w1t, b1c, w2t, b2c)

    # ---------- two-pass path (tensor too large for VMEM residency) --------
    # Pad T to a lane multiple; zero padding does not perturb sum / ssq, and
    # the padded mask columns are sliced off at the end.
    Tp = ((T + 127) // 128) * 128
    x = tf_rep if Tp == T else jnp.pad(tf_rep, ((0, 0), (0, 0), (0, Tp - T)))
    tt = _pick_time_tile(F, Tp, budget, max_time_tile)
    nT = Tp // tt

    # Pass A: fused sum / sum-of-squares sweep -> tiny (B, 2, 128) stats.
    stats = pl.pallas_call(
        _stats_kernel,
        out_shape=jax.ShapeDtypeStruct((B, 2, 128), jnp.float32),
        grid_spec=pltpu.PrefetchScalarGridSpec(
            num_scalar_prefetch=0,
            grid=(B, nT),
            in_specs=[pl.BlockSpec((1, F, tt), lambda b, t: (b, 0, t))],
            out_specs=pl.BlockSpec((1, 2, 128), lambda b, t: (b, 0, 0)),
            scratch_shapes=[pltpu.VMEM((1, tt), jnp.float32),
                            pltpu.VMEM((1, tt), jnp.float32)]),
        compiler_params=pltpu.CompilerParams(
            dimension_semantics=("parallel", "arbitrary"),
            vmem_limit_bytes=limit),
    )(x)

    # Pass B: combine stats in-kernel (no XLA glue), normalize + mask head.
    # TODO(synk): for huge-mean inputs use a centered second pass; the fused
    # path above already computes a centered variance.
    inv_n = 1.0 / float(B * F * T)   # real element count (excludes padding)
    mask = pl.pallas_call(
        functools.partial(_apply_kernel, inv_n),
        out_shape=jax.ShapeDtypeStruct((B, F, Tp), out_dtype),
        grid_spec=pltpu.PrefetchScalarGridSpec(
            num_scalar_prefetch=0,
            grid=(B, nT),
            in_specs=[
                pl.BlockSpec((B, 2, 128), lambda b, t: (0, 0, 0)),  # stats
                _x_tile_spec(F, tt, buffered=True),                 # x tile
                pl.BlockSpec((H, F), lambda b, t: (0, 0)),          # W1ᵀ
                pl.BlockSpec((H, 1), lambda b, t: (0, 0)),          # b1
                pl.BlockSpec((F, H), lambda b, t: (0, 0)),          # W2ᵀ
                pl.BlockSpec((F, 1), lambda b, t: (0, 0)),          # b2
            ],
            out_specs=pl.BlockSpec((1, F, tt), lambda b, t: (b, 0, t))),
        compiler_params=pltpu.CompilerParams(
            dimension_semantics=("parallel", "parallel"),
            vmem_limit_bytes=limit),
    )(stats, x, w1t, b1c, w2t, b2c)
    return mask if Tp == T else mask[:, :, :T]


if __name__ == "__main__":
    # Small shapes consistent with a TF-representation masker input:
    # batch=2, n_filters=32, n_frames=384, hidden=64.
    B, F, T, H = 2, 32, 384, 64

    key = jax.random.PRNGKey(0)
    k_x, k_w1, k_b1, k_w2, k_b2 = jax.random.split(key, 5)

    tf_rep = jax.random.normal(k_x, (B, F, T), dtype=jnp.float32)
    w1 = jax.random.normal(k_w1, (F, H), dtype=jnp.float32) * (1.0 / F ** 0.5)
    b1 = jax.random.normal(k_b1, (H,), dtype=jnp.float32) * 0.01
    w2 = jax.random.normal(k_w2, (H, F), dtype=jnp.float32) * (1.0 / H ** 0.5)
    b2 = jax.random.normal(k_b2, (F,), dtype=jnp.float32) * 0.01

    # Pure-JAX reference (PyTorch-style (B*T, F) orientation; bf16 at the dot
    # boundary with f32 accumulation, matching the kernels).
    def ref(x):
        mu = jnp.mean(x)
        var = jnp.mean((x - mu) ** 2)
        xn = (x - mu) / jnp.sqrt(var + EPS)
        x2 = jnp.transpose(xn, (0, 2, 1)).reshape(B * T, F)
        h = jnp.dot(x2.astype(jnp.bfloat16), w1.astype(jnp.bfloat16),
                    preferred_element_type=jnp.float32) + b1
        h = jnp.maximum(h, 0.0)
        logits = jnp.dot(h.astype(jnp.bfloat16), w2.astype(jnp.bfloat16),
                         preferred_element_type=jnp.float32) + b2
        return jnp.transpose(jax.nn.sigmoid(logits).reshape(B, T, F),
                             (0, 2, 1))

    expected = ref(tf_rep)

    # Fused single-launch path (selected automatically at these sizes).
    mask = jax.block_until_ready(plain_model_forward(tf_rep, w1, b1, w2, b2))
    assert mask.shape == (B, F, T)
    err = float(jnp.max(jnp.abs(mask - expected)))
    assert err < 2e-2, f"fused path max abs err {err}"

    # Two-pass tiled path (what large tensors take), forced here with small
    # time tiles so the accumulation / in-kernel stats-combine is exercised.
    mask2 = jax.block_until_ready(
        plain_model_forward(tf_rep, w1, b1, w2, b2,
                            force_two_pass=True, max_time_tile=128))
    err2 = float(jnp.max(jnp.abs(mask2 - expected)))
    assert err2 < 2e-2, f"two-pass path max abs err {err2}"

    print("KERNEL_OK")
</pallas_src>

<mosaic_0001>
module attributes {stable_mosaic.version = 11 : i64} {
  func.func @_fused_kernel(%arg0: i32, %arg1: memref<2x32x384xf32, #tpu.memory_space<vmem>>, %arg2: memref<64x32xbf16, #tpu.memory_space<vmem>>, %arg3: memref<64x1xf32, #tpu.memory_space<vmem>>, %arg4: memref<32x64xbf16, #tpu.memory_space<vmem>>, %arg5: memref<32x1xf32, #tpu.memory_space<vmem>>, %arg6: memref<2x32x384xf32, #tpu.memory_space<vmem>>) attributes {dimension_semantics = [#tpu.dimension_semantics<arbitrary>], iteration_bounds = array<i64: 1>, scalar_prefetch = 0 : i64, scratch_operands = 0 : i64, tpu.core_type = #tpu.core_type<tc>, window_params = [{pipeline_mode = #tpu.pipeline_mode<synchronous>, transform_indices = @transform_0, window_bounds = array<i64: 2, 32, 384>}, {pipeline_mode = #tpu.pipeline_mode<synchronous>, transform_indices = @transform_1, window_bounds = array<i64: 64, 32>}, {pipeline_mode = #tpu.pipeline_mode<synchronous>, transform_indices = @transform_2, window_bounds = array<i64: 64, 1>}, {pipeline_mode = #tpu.pipeline_mode<synchronous>, transform_indices = @transform_3, window_bounds = array<i64: 32, 64>}, {pipeline_mode = #tpu.pipeline_mode<synchronous>, transform_indices = @transform_4, window_bounds = array<i64: 32, 1>}, {pipeline_mode = #tpu.pipeline_mode<synchronous>, transform_indices = @transform_5, window_bounds = array<i64: 2, 32, 384>}]} {
    %c0 = arith.constant 0 : index
    %c0_0 = arith.constant 0 : index
    %c0_1 = arith.constant 0 : index
    %0 = vector.load %arg1[%c0, %c0_0, %c0_1] : memref<2x32x384xf32, #tpu.memory_space<vmem>>, vector<2x32x384xf32>
    %1 = vector.shape_cast %0 : vector<2x32x384xf32> to vector<1x2x32x384xf32>
    %cst = arith.constant dense<0.000000e+00> : vector<1xf32>
    %2 = vector.multi_reduction <add>, %1, %cst [1, 2, 3] : vector<1x2x32x384xf32> to vector<1xf32>
    %3 = vector.shape_cast %2 : vector<1xf32> to vector<1x1x1x1xf32>
    %4 = vector.extract %3[0, 0, 0, 0] : f32 from vector<1x1x1x1xf32>
    %cst_2 = arith.constant 4.06901054E-5 : f32
    %5 = arith.mulf %4, %cst_2 : f32
    %6 = vector.broadcast %5 : f32 to vector<2x32x384xf32>
    %7 = arith.subf %0, %6 : vector<2x32x384xf32>
    %8 = arith.mulf %7, %7 : vector<2x32x384xf32>
    %9 = vector.shape_cast %8 : vector<2x32x384xf32> to vector<1x2x32x384xf32>
    %cst_3 = arith.constant dense<0.000000e+00> : vector<1xf32>
    %10 = vector.multi_reduction <add>, %9, %cst_3 [1, 2, 3] : vector<1x2x32x384xf32> to vector<1xf32>
    %11 = vector.shape_cast %10 : vector<1xf32> to vector<1x1x1x1xf32>
    %12 = vector.extract %11[0, 0, 0, 0] : f32 from vector<1x1x1x1xf32>
    %cst_4 = arith.constant 4.06901054E-5 : f32
    %13 = arith.mulf %12, %cst_4 : f32
    %cst_5 = arith.constant 9.99999974E-6 : f32
    %14 = arith.addf %13, %cst_5 : f32
    %15 = math.rsqrt %14 : f32
    %16 = vector.broadcast %15 : f32 to vector<2x32x384xf32>
    %17 = arith.mulf %7, %16 : vector<2x32x384xf32>
    %c0_6 = arith.constant 0 : index
    %c0_7 = arith.constant 0 : index
    %18 = vector.load %arg3[%c0_6, %c0_7] : memref<64x1xf32, #tpu.memory_space<vmem>>, vector<64x1xf32>
    %c0_8 = arith.constant 0 : index
    %c0_9 = arith.constant 0 : index
    %19 = vector.load %arg5[%c0_8, %c0_9] : memref<32x1xf32, #tpu.memory_space<vmem>>, vector<32x1xf32>
    %c0_10 = arith.constant 0 : index
    %c0_11 = arith.constant 0 : index
    %20 = vector.load %arg2[%c0_10, %c0_11] : memref<64x32xbf16, #tpu.memory_space<vmem>>, vector<64x32xbf16>
    %21 = vector.extract_strided_slice %17 {offsets = [0, 0, 0], sizes = [1, 32, 384], strides = [1, 1, 1]} : vector<2x32x384xf32> to vector<1x32x384xf32>
    %22 = vector.shape_cast %21 : vector<1x32x384xf32> to vector<32x384xf32>
    %23 = arith.truncf %22 : vector<32x384xf32> to vector<32x384xbf16>
    %cst_12 = arith.constant dense<0.000000e+00> : vector<64x384xf32>
    %24 = tpu.matmul %20, %23, %cst_12 {dimension_numbers = #tpu.dot_dimension_numbers<[1], [0], [0], [1], [0, 0, 1, 1], [], []>} : vector<64x32xbf16>, vector<32x384xbf16>, vector<64x384xf32> -> vector<64x384xf32>
    %25 = vector.broadcast %18 : vector<64x1xf32> to vector<64x384xf32>
    %26 = arith.addf %24, %25 : vector<64x384xf32>
    %cst_13 = arith.constant 0.000000e+00 : f32
    %27 = vector.broadcast %cst_13 : f32 to vector<64x384xf32>
    %28 = arith.maximumf %26, %27 : vector<64x384xf32>
    %c0_14 = arith.constant 0 : index
    %c0_15 = arith.constant 0 : index
    %29 = vector.load %arg4[%c0_14, %c0_15] : memref<32x64xbf16, #tpu.memory_space<vmem>>, vector<32x64xbf16>
    %30 = arith.truncf %28 : vector<64x384xf32> to vector<64x384xbf16>
    %cst_16 = arith.constant dense<0.000000e+00> : vector<32x384xf32>
    %31 = tpu.matmul %29, %30, %cst_16 {dimension_numbers = #tpu.dot_dimension_numbers<[1], [0], [0], [1], [0, 0, 1, 1], [], []>} : vector<32x64xbf16>, vector<64x384xbf16>, vector<32x384xf32> -> vector<32x384xf32>
    %32 = vector.broadcast %19 : vector<32x1xf32> to vector<32x384xf32>
    %33 = arith.addf %31, %32 : vector<32x384xf32>
    %34 = arith.negf %33 : vector<32x384xf32>
    %35 = math.exp %34 : vector<32x384xf32>
    %cst_17 = arith.constant 1.000000e+00 : f32
    %36 = vector.broadcast %cst_17 : f32 to vector<32x384xf32>
    %37 = arith.addf %36, %35 : vector<32x384xf32>
    %38 = arith.divf %36, %37 : vector<32x384xf32>
    %c0_18 = arith.constant 0 : index
    %c0_19 = arith.constant 0 : index
    %c0_20 = arith.constant 0 : index
    %39 = vector.load %arg6[%c0_18, %c0_19, %c0_20] : memref<2x32x384xf32, #tpu.memory_space<vmem>>, vector<1x32x384xf32>
    %40 = vector.shape_cast %39 : vector<1x32x384xf32> to vector<32x384xf32>
    %41 = vector.shape_cast %38 : vector<32x384xf32> to vector<1x32x384xf32>
    tpu.vector_store %arg6[%c0_18, %c0_19, %c0_20], %41 {strides = array<i32>} : memref<2x32x384xf32, #tpu.memory_space<vmem>>, vector<1x32x384xf32>,
    %c0_21 = arith.constant 0 : index
    %c0_22 = arith.constant 0 : index
    %42 = vector.load %arg2[%c0_21, %c0_22] : memref<64x32xbf16, #tpu.memory_space<vmem>>, vector<64x32xbf16>
    %43 = vector.extract_strided_slice %17 {offsets = [1, 0, 0], sizes = [1, 32, 384], strides = [1, 1, 1]} : vector<2x32x384xf32> to vector<1x32x384xf32>
    %44 = vector.shape_cast %43 : vector<1x32x384xf32> to vector<32x384xf32>
    %45 = arith.truncf %44 : vector<32x384xf32> to vector<32x384xbf16>
    %cst_23 = arith.constant dense<0.000000e+00> : vector<64x384xf32>
    %46 = tpu.matmul %42, %45, %cst_23 {dimension_numbers = #tpu.dot_dimension_numbers<[1], [0], [0], [1], [0, 0, 1, 1], [], []>} : vector<64x32xbf16>, vector<32x384xbf16>, vector<64x384xf32> -> vector<64x384xf32>
    %47 = vector.broadcast %18 : vector<64x1xf32> to vector<64x384xf32>
    %48 = arith.addf %46, %47 : vector<64x384xf32>
    %cst_24 = arith.constant 0.000000e+00 : f32
    %49 = vector.broadcast %cst_24 : f32 to vector<64x384xf32>
    %50 = arith.maximumf %48, %49 : vector<64x384xf32>
    %c0_25 = arith.constant 0 : index
    %c0_26 = arith.constant 0 : index
    %51 = vector.load %arg4[%c0_25, %c0_26] : memref<32x64xbf16, #tpu.memory_space<vmem>>, vector<32x64xbf16>
    %52 = arith.truncf %50 : vector<64x384xf32> to vector<64x384xbf16>
    %cst_27 = arith.constant dense<0.000000e+00> : vector<32x384xf32>
    %53 = tpu.matmul %51, %52, %cst_27 {dimension_numbers = #tpu.dot_dimension_numbers<[1], [0], [0], [1], [0, 0, 1, 1], [], []>} : vector<32x64xbf16>, vector<64x384xbf16>, vector<32x384xf32> -> vector<32x384xf32>
    %54 = vector.broadcast %19 : vector<32x1xf32> to vector<32x384xf32>
    %55 = arith.addf %53, %54 : vector<32x384xf32>
    %56 = arith.negf %55 : vector<32x384xf32>
    %57 = math.exp %56 : vector<32x384xf32>
    %cst_28 = arith.constant 1.000000e+00 : f32
    %58 = vector.broadcast %cst_28 : f32 to vector<32x384xf32>
    %59 = arith.addf %58, %57 : vector<32x384xf32>
    %60 = arith.divf %58, %59 : vector<32x384xf32>
    %c1 = arith.constant 1 : index
    %c0_29 = arith.constant 0 : index
    %c0_30 = arith.constant 0 : index
    %61 = vector.load %arg6[%c1, %c0_29, %c0_30] : memref<2x32x384xf32, #tpu.memory_space<vmem>>, vector<1x32x384xf32>
    %62 = vector.shape_cast %61 : vector<1x32x384xf32> to vector<32x384xf32>
    %63 = vector.shape_cast %60 : vector<32x384xf32> to vector<1x32x384xf32>
    tpu.vector_store %arg6[%c1, %c0_29, %c0_30], %63 {strides = array<i32>} : memref<2x32x384xf32, #tpu.memory_space<vmem>>, vector<1x32x384xf32>,
    return
  }
  func.func @transform_0(%arg0: i32) -> (i32, i32, i32) {
    %c0_i32 = arith.constant 0 : i32
    %c0_i32_0 = arith.constant 0 : i32
    %c0_i32_1 = arith.constant 0 : i32
    %c0_i32_2 = arith.constant 0 : i32
    return %c0_i32, %c0_i32_0, %c0_i32_1 : i32, i32, i32
  }
  func.func @transform_1(%arg0: i32) -> (i32, i32) {
    %c0_i32 = arith.constant 0 : i32
    %c0_i32_0 = arith.constant 0 : i32
    %c0_i32_1 = arith.constant 0 : i32
    return %c0_i32, %c0_i32_0 : i32, i32
  }
  func.func @transform_2(%arg0: i32) -> (i32, i32) {
    %c0_i32 = arith.constant 0 : i32
    %c0_i32_0 = arith.constant 0 : i32
    %c0_i32_1 = arith.constant 0 : i32
    return %c0_i32, %c0_i32_0 : i32, i32
  }
  func.func @transform_3(%arg0: i32) -> (i32, i32) {
    %c0_i32 = arith.constant 0 : i32
    %c0_i32_0 = arith.constant 0 : i32
    %c0_i32_1 = arith.constant 0 : i32
    return %c0_i32, %c0_i32_0 : i32, i32
  }
  func.func @transform_4(%arg0: i32) -> (i32, i32) {
    %c0_i32 = arith.constant 0 : i32
    %c0_i32_0 = arith.constant 0 : i32
    %c0_i32_1 = arith.constant 0 : i32
    return %c0_i32, %c0_i32_0 : i32, i32
  }
  func.func @transform_5(%arg0: i32) -> (i32, i32, i32) {
    %c0_i32 = arith.constant 0 : i32
    %c0_i32_0 = arith.constant 0 : i32
    %c0_i32_1 = arith.constant 0 : i32
    %c0_i32_2 = arith.constant 0 : i32
    return %c0_i32, %c0_i32_0, %c0_i32_1 : i32, i32, i32
  }
}

</mosaic_0001>

<bundles_post_ra>
// kernel: tpu_custom_call.1
= control target key start
LH: loop header
LB: loop body
LE: loop exit
PB: predicated region body
PF: predicated region fallthrough
CT: control target
= control target key end

     0   :  { %10 = vsyncpa [#allocation3], 0  ;;  %s2273_s0 = inlined_call_operand.hbm [shape: f32[2,32,384], index: 0, kind: input, shape index: {}]   ;;  %s2274_s1 = inlined_call_operand.vmem [shape: bf16[64,32], index: 1, kind: input, shape index: {}]   ;;  %s2275_s2 = inlined_call_operand.vmem [shape: f32[64,1], index: 2, kind: input, shape index: {}]   ;;  %s2276_s3 = inlined_call_operand.vmem [shape: bf16[32,64], index: 3, kind: input, shape index: {}]   ;;  %s2277_s4 = inlined_call_operand.vmem [shape: f32[32,1], index: 4, kind: input, shape index: {}]   ;;  %s2278_s5 = inlined_call_operand.hbm [shape: f32[2,32,384], index: 5, kind: output, shape index: {}]  }
   0x1   :  { %11 = vsyncpa [#allocation4], 0  ;;  %s16_s20 = sshll.u32 %s2273_s0, 4  ;;  %s1571_s21 = smov [#allocation2]   ;;  %s17_s20 = int_to_ptr.hbm [resolvable:$true] %s16_s20 }
   0x2   :  { %s18_s22 = sshll.u32 %s1571_s21, 4  ;;  %s1572_s23 = smov 384   ;;  %s19_s22 = int_to_ptr.vmem [resolvable:$true] %s18_s22 }
   0x3   :  { %s1573_s24 = smov 24  }
   0x4   :  { %24 = dma.hbm_to_vmem [thread:$0]  %s17_s20, 3072, %s19_s22, [#allocation3], %s1572_s23, %s1572_s23, %s1573_s24  }
   0x5   :  { %1567 = dma.done.wait [#allocation3], 3072  }
   0x6   :  { %1568 = vsyncadd [#allocation3], 4294964224  ;;  %v38_v0 = vld [vmem:[#allocation2] sm:$0xff]  ;;  %v39_v1 = vld [vmem:[#allocation2 + $0x8] sm:$0xff]  ;;  %vm301_vm3 = vcmask 261120   ;;  %vm471_vm4 = vcmask 523264  }
   0x7   :  { %v40_v2 = vld [vmem:[#allocation2 + $0x10] sm:$0xff]  ;;  %v62_v3 = vadd.f32 %v39_v1, %v38_v0  ;;  %v41_v4 = vld [vmem:[#allocation2 + $0x18] sm:$0xff]  ;;  %v42_v6 = vld [vmem:[#allocation2 + $0x20] sm:$0xff]  ;;  %s1268_s30 = sshll.u32 %s2278_s5, 4  ;;  %s1269_s30 = int_to_ptr.hbm [resolvable:$true] %s1268_s30 }
   0x8   :  { %v43_v8 = vld [vmem:[#allocation2 + $0x28] sm:$0xff]  ;;  %v44_v10 = vld [vmem:[#allocation2 + $0x30] sm:$0xff]  ;;  %v45_v12 = vld [vmem:[#allocation2 + $0x38] sm:$0xff] }
   0x9   :  { %v63_v5 = vadd.f32 %v62_v3, %v40_v2  ;;  %v1612_v14 = vld [vmem:[#allocation2 + $0x40] sm:$0xff]  ;;  %v1614_v16 = vld [vmem:[#allocation2 + $0x48] sm:$0xff]  ;;  %v1617_v18 = vld [vmem:[#allocation2 + $0x50] sm:$0xff] }
   0xa   :  { %v1620_v20 = vld [vmem:[#allocation2 + $0x58] sm:$0xff]  ;;  %v1623_v22 = vld [vmem:[#allocation2 + $0x60] sm:$0xff]  ;;  %v1626_v24 = vld [vmem:[#allocation2 + $0x68] sm:$0xff] }
   0xb   :  { %v64_v7 = vadd.f32 %v63_v5, %v41_v4  ;;  %v1629_v26 = vld [vmem:[#allocation2 + $0x70] sm:$0xff]  ;;  %v1632_v28 = vld [vmem:[#allocation2 + $0x78] sm:$0xff]  ;;  %v1635_v30 = vld [vmem:[#allocation2 + $0x80] sm:$0xff] }
   0xc   :  { %v1638_v32 = vld [vmem:[#allocation2 + $0x88] sm:$0xff]  ;;  %v1641_v34 = vld [vmem:[#allocation2 + $0x90] sm:$0xff]  ;;  %v1644_v36 = vld [vmem:[#allocation2 + $0x98] sm:$0xff] }
   0xd   :  { %v65_v9 = vadd.f32 %v64_v7, %v42_v6  ;;  %v1647_v38 = vld [vmem:[#allocation2 + $0xa0] sm:$0xff]  ;;  %v1650_v40 = vld [vmem:[#allocation2 + $0xa8] sm:$0xff]  ;;  %v1653_v42 = vld [vmem:[#allocation2 + $0xb0] sm:$0xff] }
   0xe   :  { %v1656_v44 = vld [vmem:[#allocation2 + $0xb8] sm:$0xff] }
   0xf   :  { %v66_v11 = vadd.f32 %v65_v9, %v43_v8 }
  0x11   :  { %v67_v13 = vadd.f32 %v66_v11, %v44_v10 }
  0x13   :  { %v68_v15 = vadd.f32 %v67_v13, %v45_v12 }
  0x15   :  { %v69_v17 = vadd.f32 %v68_v15, %v1612_v14 }
  0x17   :  { %v70_v19 = vadd.f32 %v69_v17, %v1614_v16 }
  0x19   :  { %v71_v21 = vadd.f32 %v70_v19, %v1617_v18 }
  0x1b   :  { %v72_v23 = vadd.f32 %v71_v21, %v1620_v20 }
  0x1d   :  { %v73_v25 = vadd.f32 %v72_v23, %v1623_v22 }
  0x1f   :  { %v74_v27 = vadd.f32 %v73_v25, %v1626_v24 }
  0x21   :  { %v75_v29 = vadd.f32 %v74_v27, %v1629_v26 }
  0x23   :  { %v76_v31 = vadd.f32 %v75_v29, %v1632_v28 }
  0x25   :  { %v77_v33 = vadd.f32 %v76_v31, %v1635_v30 }
  0x27   :  { %v78_v35 = vadd.f32 %v77_v33, %v1638_v32 }
  0x29   :  { %v79_v37 = vadd.f32 %v78_v35, %v1641_v34 }
  0x2b   :  { %v80_v39 = vadd.f32 %v79_v37, %v1644_v36 }
  0x2d   :  { %v81_v41 = vadd.f32 %v80_v39, %v1647_v38 }
  0x2f   :  { %v82_v43 = vadd.f32 %v81_v41, %v1650_v40 }
  0x31   :  { %v83_v45 = vadd.f32 %v82_v43, %v1653_v42 }
  0x33   :  { %v84_v46 = vadd.f32 %v83_v45, %v1656_v44 }
  0x35   :  { %85 = vadd.xlane.f32.xlu0 %v84_v46 }
  0xa8   :  { %v86_v47 = vpop.xlane.xlu0 %85 }
  0xa9   :  { %v87_v48 = vrot.slane %v86_v47, 4 }
  0xab   :  { %v88_v49 = vadd.f32 %v87_v48, %v86_v47 }
  0xad   :  { %v89_v50 = vrot.slane %v88_v49, 2 }
  0xaf   :  { %v90_v51 = vadd.f32 %v89_v50, %v88_v49 }
  0xb1   :  { %v91_v52 = vrot.slane %v90_v51, 1 }
  0xb3   :  { %v92_v53 = vadd.f32 %v91_v52, %v90_v51 }
  0xb5   :  { %1407 = vpush %v92_v53 }
  0xe6   :  { %s1408_s0 = spop %1407 }
  0xe7   :  { %s94_s25 = smul.f32 4.0690105e-05, %s1408_s0 }
  0xe9   :  { %v1660_v54 = vstv %s94_s25 }
  0xea   :  { %v1663_v55 = vsub.f32 %v38_v0, %v1660_v54  ;;  %v1666_v56 = vsub.f32 %v39_v1, %v1660_v54  ;;  %v1669_v57 = vsub.f32 %v40_v2, %v1660_v54  ;;  %v1676_v60 = vsub.f32 %v41_v4, %v1660_v54 }
  0xeb   :  { %v1679_v61 = vsub.f32 %v42_v6, %v1660_v54  ;;  %v1684_v0 = vsub.f32 %v43_v8, %v1660_v54  ;;  %v1689_v3 = vsub.f32 %v44_v10, %v1660_v54  ;;  %v1694_v6 = vsub.f32 %v45_v12, %v1660_v54 }
  0xec   :  { %v120_v58 = vmul.f32 %v1663_v55, %v1663_v55  ;;  %v121_v59 = vmul.f32 %v1666_v56, %v1666_v56  ;;  %v122_v62 = vmul.f32 %v1669_v57, %v1669_v57  ;;  %v123_v1 = vmul.f32 %v1676_v60, %v1676_v60 }
  0xed   :  { %v124_v4 = vmul.f32 %v1679_v61, %v1679_v61  ;;  %v125_v7 = vmul.f32 %v1684_v0, %v1684_v0  ;;  %v1700_v8 = vsub.f32 %v1612_v14, %v1660_v54  ;;  %v126_v11 = vmul.f32 %v1689_v3, %v1689_v3 }
  0xee   :  { %v144_v63 = vadd.f32 %v121_v59, %v120_v58  ;;  %v1706_v13 = vsub.f32 %v1614_v16, %v1660_v54  ;;  %v127_v12 = vmul.f32 %v1694_v6, %v1694_v6  ;;  %v1712_v17 = vsub.f32 %v1617_v18, %v1660_v54 }
  0xef   :  { %v128_v14 = vmul.f32 %v1700_v8, %v1700_v8  ;;  %v1718_v21 = vsub.f32 %v1620_v20, %v1660_v54  ;;  %v1724_v25 = vsub.f32 %v1623_v22, %v1660_v54  ;;  %v1730_v29 = vsub.f32 %v1626_v24, %v1660_v54 }
  0xf0   :  { %v145_v2 = vadd.f32 %v144_v63, %v122_v62  ;;  %v129_v16 = vmul.f32 %v1706_v13, %v1706_v13  ;;  %v130_v18 = vmul.f32 %v1712_v17, %v1712_v17  ;;  %v1736_v33 = vsub.f32 %v1629_v26, %v1660_v54 }
  0xf1   :  { %v131_v20 = vmul.f32 %v1718_v21, %v1718_v21  ;;  %v132_v22 = vmul.f32 %v1724_v25, %v1724_v25  ;;  %v1742_v37 = vsub.f32 %v1632_v28, %v1660_v54  ;;  %v133_v24 = vmul.f32 %v1730_v29, %v1730_v29 }
  0xf2   :  { %v146_v5 = vadd.f32 %v145_v2, %v123_v1  ;;  %v1748_v41 = vsub.f32 %v1635_v30, %v1660_v54  ;;  %v134_v26 = vmul.f32 %v1736_v33, %v1736_v33  ;;  %v1754_v45 = vsub.f32 %v1638_v32, %v1660_v54 }
  0xf3   :  { %v135_v28 = vmul.f32 %v1742_v37, %v1742_v37  ;;  %v1760_v47 = vsub.f32 %v1641_v34, %v1660_v54  ;;  %v1766_v49 = vsub.f32 %v1644_v36, %v1660_v54  ;;  %v1772_v51 = vsub.f32 %v1647_v38, %v1660_v54 }
  0xf4   :  { %v147_v9 = vadd.f32 %v146_v5, %v124_v4  ;;  %v136_v30 = vmul.f32 %v1748_v41, %v1748_v41  ;;  %v137_v32 = vmul.f32 %v1754_v45, %v1754_v45  ;;  %v1778_v53 = vsub.f32 %v1650_v40, %v1660_v54 }
  0xf5   :  { %v138_v34 = vmul.f32 %v1760_v47, %v1760_v47  ;;  %v139_v36 = vmul.f32 %v1766_v49, %v1766_v49  ;;  %v1784_v59 = vsub.f32 %v1653_v42, %v1660_v54  ;;  %v140_v38 = vmul.f32 %v1772_v51, %v1772_v51 }
  0xf6   :  { %v148_v10 = vadd.f32 %v147_v9, %v125_v7  ;;  %v1790_v63 = vsub.f32 %v1656_v44, %v1660_v54  ;;  %v141_v40 = vmul.f32 %v1778_v53, %v1778_v53 }
  0xf7   :  { %v142_v2 = vmul.f32 %v1784_v59, %v1784_v59 }
  0xf8   :  { %v149_v15 = vadd.f32 %v148_v10, %v126_v11  ;;  %v143_v42 = vmul.f32 %v1790_v63, %v1790_v63 }
  0xfa   :  { %v150_v19 = vadd.f32 %v149_v15, %v127_v12 }
  0xfc   :  { %v151_v23 = vadd.f32 %v150_v19, %v128_v14 }
  0xfe   :  { %v152_v27 = vadd.f32 %v151_v23, %v129_v16 }
 0x100   :  { %v153_v31 = vadd.f32 %v152_v27, %v130_v18 }
 0x102   :  { %v154_v35 = vadd.f32 %v153_v31, %v131_v20 }
 0x104   :  { %v155_v39 = vadd.f32 %v154_v35, %v132_v22  ;;  %v221_v22 = vld [vmem:[%s2275_s2 + $0x30] sm:$0xff]  ;;  %v1574_v35 = vmov 0  }
 0x105   :  { %1418 = vset.pattern.permute.xlu1 %v1574_v35  ;;  %1419 = vset.pattern.permute.xlu2 %v1574_v35 }
 0x106   :  { %v156_v43 = vadd.f32 %v155_v39, %v133_v24  ;;  %273 = vperm.xlu1 %1418, %v221_v22   ;;  %1420 = vset.pattern.permute.xlu0 %v1574_v35  ;;  %v222_v24 = vld [vmem:[%s2275_s2 + $0x38] sm:$0xff] }
 0x107   :  { %v218_v39 = vld [vmem:[%s2275_s2 + $0x18] sm:$0xff] }
 0x108   :  { %v157_v46 = vadd.f32 %v156_v43, %v134_v26  ;;  %v219_v26 = vld [vmem:[%s2275_s2 + $0x20] sm:$0xff]  ;;  %v216_v43 = vld [vmem:[%s2275_s2 + $0x8] sm:$0xff] }
 0x109   :  { %263 = vperm.xlu2 %1419, %v219_v26  }
 0x10a   :  { %v158_v48 = vadd.f32 %v157_v46, %v135_v28  ;;  %v217_v28 = vld [vmem:[%s2275_s2 + $0x10] sm:$0xff] }
 0x10c   :  { %v159_v50 = vadd.f32 %v158_v48, %v136_v30 }
 0x10e   :  { %v160_v52 = vadd.f32 %v159_v50, %v137_v32  ;;  %278 = vperm.xlu1 %1418, %v222_v24  }
 0x110   :  { %v161_v58 = vadd.f32 %v160_v52, %v138_v34 }
 0x112   :  { %v162_v62 = vadd.f32 %v161_v58, %v139_v36 }
 0x114   :  { %v163_v1 = vadd.f32 %v162_v62, %v140_v38 }
 0x116   :  { %v164_v4 = vadd.f32 %v163_v1, %v141_v40  ;;  %258 = vperm.xlu1 %1418, %v218_v39   ;;  %v1392_v1 = vld [vmem:[%s2274_s1 + $0x18] sm:$0xff] }
 0x118   :  { %v165_v5 = vadd.f32 %v164_v4, %v142_v2  ;;  %v1390_v4 = vld [vmem:[%s2274_s1 + $0x8] sm:$0xff] }
 0x11a   :  { %v166_v7 = vadd.f32 %v165_v5, %v143_v42  ;;  %v226_v42 = vld [vmem:[%s2277_s4 + $0x18] sm:$0xff]  ;;  %v1391_v5 = vld [vmem:[%s2274_s1 + $0x10] sm:$0xff] }
 0x11c   :  { %167 = vadd.xlane.f32.xlu0 %v166_v7  ;;  %v223_v7 = vld [vmem:[%s2277_s4] sm:$0xff] }
 0x11e   :  { %248 = vperm.xlu1 %1418, %v216_v43  }
 0x130   :  { %253 = vperm.xlu0 %1420, %v217_v28  }
 0x18f   :  { %v168_v9 = vpop.xlane.xlu0 %167 }
 0x190   :  { %v169_v11 = vrot.slane %v168_v9, 4 }
 0x192   :  { %v170_v10 = vadd.f32 %v169_v11, %v168_v9  ;;  %v1890_v9 = vld [vmem:[%s2274_s1] sm:$0xff]  ;;  %v225_v11 = vld [vmem:[%s2277_s4 + $0x10] sm:$0xff] }
 0x194   :  { %v171_v12 = vrot.slane %v170_v10, 2 }
 0x196   :  { %v172_v44 = vadd.f32 %v171_v12, %v170_v10  ;;  %v1902_v10 = vld [vmem:[%s2274_s1 + $0x8] sm:$0xff]  ;;  %v1909_v12 = vld [vmem:[%s2274_s1 + $0x10] sm:$0xff] }
 0x198   :  { %v173_v54 = vrot.slane %v172_v44, 1 }
 0x19a   :  { %v174_v15 = vadd.f32 %v173_v54, %v172_v44  ;;  %v1916_v44 = vld [vmem:[%s2274_s1 + $0x18] sm:$0xff]  ;;  %v1920_v54 = vpop.permute.xlu1 %273 }
 0x19c   :  { %1409 = vpush %v174_v15  ;;  %v1922_v15 = vpop.permute.xlu2 %263 }
 0x1cd   :  { %s1410_s26 = spop %1409 }
 0x1ce   :  { %s176_s27 = smul.f32 4.0690105e-05, %s1410_s26 }
 0x1d0   :  { %s177_s28 = sadd.f32 1e-05, %s176_s27 }
 0x1d2   :  { %v178_v14 = vstv %s177_s28 }
 0x1d3   :  { %1421 = vrsqrt.f32 %v178_v14  ;;  %vm185_vm1 = vweird.f32 %v178_v14 }
 0x1d9   :  { %v1422_v19 = vpop.eup %1421 }
 0x1da   :  { %v180_v16 = vmul.f32 %v1422_v19, %v178_v14  ;;  %vm186_vm0 = vweird.f32 %v1422_v19  ;;  %v1924_v14 = vpop.permute.xlu1 %278 }
 0x1db   :  { %vm187_vm2 = vmor %vm185_vm1, %vm186_vm0 }
 0x1dc   :  { %v181_v23 = vmul.f32 %v1422_v19, %v180_v16 }
 0x1de   :  { %v182_v18 = vmul.f32 0.5, %v181_v23 }
 0x1e0   :  { %v183_v27 = vsub.f32 1.5, %v182_v18 }
 0x1e2   :  { %v184_v20 = vmul.f32 %v1422_v19, %v183_v27  ;;  %v1928_v16 = vpop.permute.xlu1 %258 }
 0x1e4   :  { %v188_v31 = vsel %vm187_vm2, %v1422_v19, %v184_v20 }
 0x1e5   :  { %1411 = vpush %v188_v31 }
 0x1ea   :  { %v1935_v22 = vpop.permute.xlu1 %248 }
 0x216   :  { %s1412_s16 = spop %1411 }
 0x217   :  { %v1816_v46 = vstv %s1412_s16 }
 0x218   :  { %v197_v30 = vmul.f32 %v1816_v46, %v1689_v3  ;;  %v200_v48 = vmul.f32 %v1816_v46, %v1706_v13  ;;  %v198_v32 = vmul.f32 %v1816_v46, %v1694_v6  ;;  %v201_v50 = vmul.f32 %v1816_v46, %v1712_v17 }
 0x219   :  { %v199_v34 = vmul.f32 %v1816_v46, %v1700_v8  ;;  %v202_v52 = vmul.f32 %v1816_v46, %v1718_v21  ;;  %v191_v36 = vmul.f32 %v1816_v46, %v1663_v55  ;;  %v194_v3 = vmul.f32 %v1816_v46, %v1676_v60  ;;  %v220_v55 = vld [vmem:[%s2275_s2 + $0x28] sm:$0xff] }
 0x21a   :  { %v238_v58 = vpack.c.bf16 %v200_v48, %v197_v30  ;;  %v239_v13 = vpack.c.bf16 %v201_v50, %v198_v32  ;;  %v192_v6 = vmul.f32 %v1816_v46, %v1666_v56  ;;  %v195_v17 = vmul.f32 %v1816_v46, %v1679_v61  ;;  %268 = vperm.xlu2 %1419, %v220_v55  }
 0x21b   :  { %v240_v38 = vpack.c.bf16 %v202_v52, %v199_v34  ;;  %v193_v8 = vmul.f32 %v1816_v46, %v1669_v57  ;;  %v196_v21 = vmul.f32 %v1816_v46, %v1684_v0  ;;  %v209_v60 = vmul.f32 %v1816_v46, %v1760_v47  ;;  %v1389_v0 = vld [vmem:[%s2274_s1] sm:$0xff] }
 0x21c   :  { %320 = vmatpush.bf16.msra.mxu0 %v238_v58  ;;  %349 = vmatpush.bf16.msra.mxu1 %v239_v13  ;;  %v212_v56 = vmul.f32 %v1816_v46, %v1778_v53  ;;  %v235_v61 = vpack.c.bf16 %v194_v3, %v191_v36  ;;  %v236_v62 = vpack.c.bf16 %v195_v17, %v192_v6 }
 0x21d   :  { %1401 = vmatpush.bf16.msra.mxu3 %v239_v13  ;;  %378 = vmatpush.bf16.msra.mxu2 %v240_v38  ;;  %v237_v57 = vpack.c.bf16 %v196_v21, %v193_v8  ;;  %v203_v47 = vmul.f32 %v1816_v46, %v1724_v25  ;;  %v206_v53 = vmul.f32 %v1816_v46, %v1742_v37  ;;  %v215_v25 = vld [vmem:[%s2275_s2] sm:$0xff]  ;;  %v224_v37 = vld [vmem:[%s2277_s4 + $0x8] sm:$0xff] }
 0x21e   :  { %v786_v40 = vpack.c.bf16 %v212_v56, %v209_v60  ;;  %448 = vperm.xlu1 %1418, %v224_v37  }
 0x21f   :  { %v783_v2 = vpack.c.bf16 %v206_v53, %v203_v47 }
 0x220   :  { %321 = vmatpush.bf16.msra.mxu0 %v235_v61  ;;  %350 = vmatpush.bf16.msra.mxu1 %v236_v62 }
 0x221   :  { %1402 = vmatpush.bf16.msra.mxu3 %v236_v62  ;;  %379 = vmatpush.bf16.msra.mxu2 %v237_v57 }
 0x222   :  { %243 = vperm.xlu2 %1419, %v215_v25  }
 0x223   :  { %1297 = vmatmul.msk.bf16.vlgmr.msra.gmra.mxu0 %vm301_vm3, %v1389_v0  ;;  %1301 = vmatmul.msk.bf16.vlgmr.msra.gmra.mxu1 %vm301_vm3, %v1389_v0 }
 0x224   :  { %827 = vmatpush.bf16.msrb.mxu1 %v786_v40  ;;  %1305 = vmatmul.msk.bf16.vlgmr.msra.gmra.mxu2 %vm301_vm3, %v1389_v0 }
 0x225   :  { %1304 = vmatmul.msk.bf16.vlgmr.msra.gmra.mxu3 %vm301_vm3, %v1392_v1 }
 0x226   :  { %458 = vperm.xlu1 %1418, %v226_v42  }
 0x228   :  { %828 = vmatpush.bf16.msrb.mxu1 %v783_v2 }
 0x22a   :  { %443 = vperm.xlu2 %1419, %v223_v7  }
 0x232   :  { %453 = vperm.xlu2 %1419, %v225_v11  }
 0x233   :  { %1298 = vmatmul.msk.bf16.gmra.mxu0 %vm301_vm3, %v1390_v4  ;;  %1302 = vmatmul.msk.bf16.gmra.mxu1 %vm301_vm3, %v1390_v4 }
 0x234   :  { %1306 = vmatmul.msk.bf16.gmra.mxu2 %vm301_vm3, %v1390_v4 }
 0x243   :  { %1299 = vmatmul.msk.bf16.gmra.mxu0 %vm301_vm3, %v1391_v5  ;;  %1303 = vmatmul.msk.bf16.gmra.mxu1 %vm301_vm3, %v1391_v5 }
 0x244   :  { %1307 = vmatmul.msk.bf16.gmra.mxu2 %vm301_vm3, %v1391_v5 }
 0x253   :  { %1300 = vmatmul.msk.bf16.gmra.mxu0 %vm301_vm3, %v1392_v1  ;;  %1351 = vmatmul.msk.bf16.vlgmr.msrb.gmra.mxu1 %vm301_vm3, %v1890_v9 }
 0x254   :  { %1308 = vmatmul.msk.bf16.gmra.mxu2 %vm301_vm3, %v1392_v1  ;;  %v1954_v1 = vpop.permute.xlu0 %253 }
 0x263   :  { %1352 = vmatmul.msk.bf16.gmra.mxu1 %vm301_vm3, %v1902_v10 }
 0x273   :  { %1353 = vmatmul.msk.bf16.gmra.mxu1 %vm301_vm3, %v1909_v12 }
 0x274   :  { %v1926_v19 = vpop.permute.xlu2 %268 }
 0x27c   :  { %v1930_v27 = vpop.permute.xlu2 %243 }
 0x283   :  { %1354 = vmatmul.msk.bf16.gmra.mxu1 %vm301_vm3, %v1916_v44 }
 0x2a0   :  { %v323_v23 = vpop.f32.mrf.mxu0  ;;  %v352_v18 = vpop.f32.mrf.mxu1 }
 0x2a1   :  { %v353_v20 = vadd.f32 %v352_v18, %v1930_v27 }
 0x2a3   :  { %v402_v39 = vmax.f32 %v353_v20, 0.0 }
 0x2a7   :  { %v1933_v31 = vpop.f32.mrf.mxu2 }
 0x2a8   :  { %v325_v35 = vpop.f32.mrf.mxu0  ;;  %v354_v24 = vpop.f32.mrf.mxu1 }
 0x2a9   :  { %v355_v26 = vadd.f32 %v354_v24, %v1935_v22  ;;  %v367_v55 = vpop.f32.mrf.mxu3 }
 0x2ab   :  { %v405_v43 = vmax.f32 %v355_v26, 0.0  ;;  %v326_v26 = vadd.f32 %v325_v35, %v1935_v22 }
 0x2ad   :  { %v1938_v28 = vpack.c.bf16 %v405_v43, %v402_v39  ;;  %v404_v35 = vmax.f32 %v326_v26, 0.0 }
 0x2af   :  { %v1940_v30 = vpop.f32.mrf.mxu2 }
 0x2b0   :  { %v328_v48 = vpop.f32.mrf.mxu0  ;;  %v1942_v32 = vpop.f32.mrf.mxu1 }
 0x2b1   :  { %v369_v5 = vpop.f32.mrf.mxu3  ;;  %v329_v11 = vadd.f32 %v328_v48, %v1954_v1  ;;  %v324_v48 = vadd.f32 %v323_v23, %v1930_v27 }
 0x2b3   :  { %v401_v23 = vmax.f32 %v324_v48, 0.0 }
 0x2b7   :  { %v386_v50 = vpop.f32.mrf.mxu2 }
 0x2b8   :  { %v330_v34 = vpop.f32.mrf.mxu0  ;;  %v1944_v52 = vpop.f32.mrf.mxu1 }
 0x2b9   :  { %v331_v2 = vadd.f32 %v330_v34, %v1928_v16 }
 0x2bb   :  { %v410_v43 = vmax.f32 %v331_v2, 0.0 }
 0x2bf   :  { %v388_v36 = vpop.f32.mrf.mxu2 }
 0x2c0   :  { %v333_v3 = vpop.f32.mrf.mxu0  ;;  %v362_v58 = vpop.f32.mrf.mxu1 }
 0x2c1   :  { %v334_v40 = vadd.f32 %v333_v3, %v1922_v15  ;;  %v368_v3 = vadd.f32 %v367_v55, %v1920_v54 }
 0x2c3   :  { %v413_v42 = vmax.f32 %v334_v40, 0.0  ;;  %v420_v55 = vmax.f32 %v368_v3, 0.0 }
 0x2c7   :  { %v391_v13 = vpop.f32.mrf.mxu2 }
 0x2c8   :  { %v335_v6 = vpop.f32.mrf.mxu0  ;;  %v364_v17 = vpop.f32.mrf.mxu1  ;;  %v392_v18 = vadd.f32 %v391_v13, %v1922_v15  ;;  %v387_v13 = vadd.f32 %v386_v50, %v1954_v1  ;;  %v382_v50 = vadd.f32 %v1933_v31, %v1930_v27  ;;  %v1393_v31 = vld [vmem:[%s2276_s3] sm:$0xff] }
 0x2c9   :  { %v336_v57 = vadd.f32 %v335_v6, %v1926_v19  ;;  %v370_v6 = vadd.f32 %v369_v5, %v1924_v14  ;;  %v429_v5 = vpack.c.bf16 %v404_v35, %v401_v23 }
 0x2cb   :  { %v416_v25 = vmax.f32 %v336_v57, 0.0  ;;  %v423_v2 = vmax.f32 %v370_v6, 0.0 }
 0x2cd   :  { %v435_v34 = vpack.c.bf16 %v416_v25, %v413_v42  ;;  %v409_v25 = vmax.f32 %v387_v13, 0.0  ;;  %v211_v13 = vmul.f32 %v1816_v46, %v1772_v51 }
 0x2cf   :  { %v393_v38 = vpop.f32.mrf.mxu2 }
 0x2d0   :  { %v338_v8 = vpop.f32.mrf.mxu0  ;;  %v1946_v21 = vpop.f32.mrf.mxu1  ;;  %v394_v20 = vadd.f32 %v393_v38, %v1926_v19  ;;  %v407_v38 = vmax.f32 %v329_v11, 0.0 }
 0x2d1   :  { %v339_v60 = vadd.f32 %v338_v8, %v1920_v54 }
 0x2d2   :  { %v418_v57 = vmax.f32 %v394_v20, 0.0  ;;  %v432_v40 = vpack.c.bf16 %v410_v43, %v407_v38  ;;  %v214_v38 = vmul.f32 %v1816_v46, %v1790_v63 }
 0x2d3   :  { %v419_v47 = vmax.f32 %v339_v60, 0.0 }
 0x2d7   :  { %v396_v56 = vpop.f32.mrf.mxu2 }
 0x2d8   :  { %v340_v61 = vpop.f32.mrf.mxu0  ;;  %v1949_v62 = vpop.f32.mrf.mxu1  ;;  %v397_v4 = vadd.f32 %v396_v56, %v1920_v54  ;;  %v389_v56 = vadd.f32 %v388_v36, %v1928_v16  ;;  %v384_v36 = vadd.f32 %v1940_v30, %v1935_v22  ;;  %v403_v30 = vmax.f32 %v382_v50, 0.0 }
 0x2d9   :  { %v341_v0 = vadd.f32 %v340_v61, %v1924_v14  ;;  %v415_v61 = vmax.f32 %v392_v18, 0.0  ;;  %v439_v18 = vpack.c.bf16 %v423_v2, %v420_v55  ;;  %v833_v50 = vadd.f32 %v1949_v62, %v1935_v22  ;;  %v2050_v62 = vpop.permute.xlu2 %443 }
 0x2da   :  { %v421_v8 = vmax.f32 %v397_v4, 0.0  ;;  %v406_v20 = vmax.f32 %v384_v36, 0.0 }
 0x2db   :  { %v422_v53 = vmax.f32 %v341_v0, 0.0  ;;  %v437_v42 = vpack.c.bf16 %v418_v57, %v415_v61  ;;  %v208_v61 = vmul.f32 %v1816_v46, %v1754_v45 }
 0x2dc   :  { %v431_v6 = vpack.c.bf16 %v406_v20, %v403_v30  ;;  %v2054_v20 = vpop.permute.xlu1 %448 }
 0x2dd   :  { %v438_v37 = vpack.c.bf16 %v422_v53, %v419_v47  ;;  %v363_v47 = vadd.f32 %v362_v58, %v1922_v15  ;;  %v365_v53 = vadd.f32 %v364_v17, %v1926_v19  ;;  %v358_v58 = vadd.f32 %v1942_v32, %v1954_v1 }
 0x2de   :  { %v360_v17 = vadd.f32 %v1944_v52, %v1928_v16  ;;  %v210_v32 = vmul.f32 %v1816_v46, %v1766_v49  ;;  %v213_v52 = vmul.f32 %v1816_v46, %v1784_v59  ;;  %v204_v49 = vmul.f32 %v1816_v46, %v1730_v29 }
 0x2df   :  { %v398_v7 = vpop.f32.mrf.mxu2  ;;  %482 = vmatpush.bf16.msrb.mxu3 %v438_v37  ;;  %v412_v37 = vmax.f32 %v389_v56, 0.0  ;;  %v417_v11 = vmax.f32 %v365_v53, 0.0  ;;  %v408_v26 = vmax.f32 %v358_v58, 0.0  ;;  %v207_v59 = vmul.f32 %v1816_v46, %v1748_v41 }
 0x2e0   :  { %v399_v24 = vadd.f32 %v398_v7, %v1924_v14  ;;  %v1962_v39 = vpop.f32.mrf.mxu1  ;;  %v414_v7 = vmax.f32 %v363_v47, 0.0  ;;  %v411_v43 = vmax.f32 %v360_v17, 0.0  ;;  %v788_v29 = vpack.c.bf16 %v214_v38, %v211_v13  ;;  %v2026_v17 = vld [vmem:[%s2276_s3] sm:$0xff] }
 0x2e1   :  { %v784_v56 = vpack.c.bf16 %v207_v59, %v204_v49  ;;  %v205_v41 = vmul.f32 %v1816_v46, %v1736_v33  ;;  %v836_v2 = vadd.f32 %v1962_v39, %v1954_v1 }
 0x2e2   :  { %v424_v60 = vmax.f32 %v399_v24, 0.0  ;;  %v434_v24 = vpack.c.bf16 %v412_v37, %v409_v25  ;;  %v433_v48 = vpack.c.bf16 %v411_v43, %v408_v26  ;;  %v831_v37 = vadd.f32 %v1946_v21, %v1930_v27  ;;  %v2036_v21 = vld [vmem:[%s2276_s3 + $0x8] sm:$0xff] }
 0x2e3   :  { %483 = vmatpush.bf16.msrb.mxu3 %v435_v34  ;;  %v436_v34 = vpack.c.bf16 %v417_v11, %v414_v7  ;;  %v785_v57 = vpack.c.bf16 %v208_v61, %v205_v41 }
 0x2e4   :  { %v440_v0 = vpack.c.bf16 %v424_v60, %v421_v8  ;;  %v787_v8 = vpack.c.bf16 %v213_v52, %v210_v32  ;;  %v1394_v60 = vld [vmem:[%s2276_s3 + $0x8] sm:$0xff]  ;;  %v908_v39 = vmax.f32 %v831_v37, 0.0  ;;  %s1575_s3 = smov [#allocation5]  }
 0x2e5   :  { %s1266_s27 = sshll.u32 %s1575_s3, 4  ;;  %s1267_s27 = int_to_ptr.vmem [resolvable:$true] %s1266_s27 }
 0x2e6   :  { %520 = vmatpush.bf16.msrb.mxu0 %v440_v0  ;;  %1403 = vmatpush.bf16.msrb.mxu2 %v440_v0 }
 0x2e7   :  { %484 = vmatpush.bf16.msrb.mxu3 %v432_v40 }
 0x2e8   :  { %v837_v4 = vpop.f32.mrf.mxu1 }
 0x2e9   :  { %v838_v47 = vadd.f32 %v837_v4, %v1928_v16  ;;  %v911_v4 = vmax.f32 %v833_v50, 0.0 }
 0x2ea   :  { %521 = vmatpush.bf16.msrb.mxu0 %v437_v42  ;;  %1404 = vmatpush.bf16.msrb.mxu2 %v437_v42  ;;  %v914_v42 = vmax.f32 %v836_v2, 0.0 }
 0x2eb   :  { %485 = vmatpush.bf16.msrb.mxu3 %v429_v5  ;;  %v917_v36 = vmax.f32 %v838_v47, 0.0  ;;  %v936_v5 = vpack.c.bf16 %v911_v4, %v908_v39 }
 0x2ed   :  { %v939_v58 = vpack.c.bf16 %v917_v36, %v914_v42 }
 0x2ee   :  { %522 = vmatpush.bf16.msrb.mxu0 %v434_v24  ;;  %1405 = vmatpush.bf16.msrb.mxu2 %v434_v24 }
 0x2ef   :  { %501 = vmatpush.bf16.msra.mxu3 %v439_v18 }
 0x2f0   :  { %1317 = vmatmul.msk.bf16.vlgmr.msrb.gmra.mxu3 %vm471_vm4, %v1393_v31  ;;  %v840_v3 = vpop.f32.mrf.mxu1 }
 0x2f1   :  { %v841_v45 = vadd.f32 %v840_v3, %v1922_v15 }
 0x2f2   :  { %523 = vmatpush.bf16.msrb.mxu0 %v431_v6  ;;  %1406 = vmatpush.bf16.msrb.mxu2 %v431_v6 }
 0x2f3   :  { %502 = vmatpush.bf16.msra.mxu3 %v436_v34  ;;  %v920_v23 = vmax.f32 %v841_v45, 0.0 }
 0x2f5   :  { %1321 = vmatmul.msk.bf16.vlgmr.msrb.gmra.mxu0 %vm471_vm4, %v1393_v31  ;;  %1322 = vmatmul.msk.bf16.vlgmr.msrb.gmra.mxu2 %vm471_vm4, %v1394_v60 }
 0x2f6   :  { %856 = vmatpush.bf16.msra.mxu2 %v787_v8 }
 0x2f7   :  { %503 = vmatpush.bf16.msra.mxu3 %v433_v48  ;;  %v2061_v48 = vpop.permute.xlu1 %458 }
 0x2f8   :  { %v842_v51 = vpop.f32.mrf.mxu1 }
 0x2f9   :  { %v843_v33 = vadd.f32 %v842_v51, %v1926_v19 }
 0x2fa   :  { %857 = vmatpush.bf16.msra.mxu2 %v784_v56 }
 0x2fb   :  { %504 = vmatpush.bf16.msra.mxu3 %v1938_v28  ;;  %v923_v55 = vmax.f32 %v843_v33, 0.0 }
 0x2fd   :  { %v942_v25 = vpack.c.bf16 %v923_v55, %v920_v23 }
 0x2ff   :  { %885 = vmatpush.bf16.msrb.mxu3 %v788_v29 }
 0x300   :  { %1318 = vmatmul.msk.bf16.gmra.mxu3 %vm471_vm4, %v1394_v60  ;;  %v845_v63 = vpop.f32.mrf.mxu1 }
 0x301   :  { %v846_v0 = vadd.f32 %v845_v63, %v1920_v54 }
 0x303   :  { %886 = vmatpush.bf16.msrb.mxu3 %v785_v57  ;;  %v926_v46 = vmax.f32 %v846_v0, 0.0 }
 0x305   :  { %1355 = vmatmul.msk.bf16.vlgmr.msra.gmra.mxu2 %vm301_vm3, %v1890_v9 }
 0x308   :  { %v847_v35 = vpop.f32.mrf.mxu1 }
 0x309   :  { %v848_v40 = vadd.f32 %v847_v35, %v1924_v14 }
 0x30b   :  { %v929_v28 = vmax.f32 %v848_v40, 0.0 }
 0x30d   :  { %v945_v53 = vpack.c.bf16 %v929_v28, %v926_v46 }
 0x30f   :  { %968 = vmatpush.bf16.msra.mxu0 %v945_v53 }
 0x310   :  { %1319 = vmatmul.msk.bf16.vlgmr.msra.gmra.mxu3 %vm471_vm4, %v1393_v31 }
 0x313   :  { %969 = vmatpush.bf16.msra.mxu0 %v942_v25 }
 0x315   :  { %1356 = vmatmul.msk.bf16.gmra.mxu2 %vm301_vm3, %v1902_v10 }
 0x317   :  { %970 = vmatpush.bf16.msra.mxu0 %v939_v58 }
 0x31b   :  { %971 = vmatpush.bf16.msra.mxu0 %v936_v5 }
 0x31e   :  { %1371 = vmatmul.msk.bf16.vlgmr.msra.gmra.mxu0 %vm471_vm4, %v2026_v17 }
 0x320   :  { %1320 = vmatmul.msk.bf16.gmra.mxu3 %vm471_vm4, %v1394_v60 }
 0x325   :  { %1357 = vmatmul.msk.bf16.gmra.mxu2 %vm301_vm3, %v1909_v12 }
 0x32e   :  { %1372 = vmatmul.msk.bf16.gmra.mxu0 %vm471_vm4, %v2036_v21 }
 0x330   :  { %1359 = vmatmul.msk.bf16.vlgmr.msrb.gmra.mxu3 %vm301_vm3, %v1890_v9 }
 0x335   :  { %1358 = vmatmul.msk.bf16.gmra.mxu2 %vm301_vm3, %v1916_v44 }
 0x340   :  { %1360 = vmatmul.msk.bf16.gmra.mxu3 %vm301_vm3, %v1902_v10  ;;  %v2056_v10 = vpop.permute.xlu2 %453 }
 0x350   :  { %1361 = vmatmul.msk.bf16.gmra.mxu3 %vm301_vm3, %v1909_v12 }
 0x360   :  { %1362 = vmatmul.msk.bf16.gmra.mxu3 %vm301_vm3, %v1916_v44 }
 0x372   :  { %v525_v11 = vpop.f32.mrf.mxu0 }
 0x373   :  { %v487_v7 = vpop.f32.mrf.mxu3  ;;  %v526_v9 = vadd.f32 %v525_v11, %v2050_v62 }
 0x374   :  { %v488_v18 = vadd.f32 %v487_v7, %v2050_v62 }
 0x375   :  { %v1325_v30 = vmul.f32 -1.442695, %v526_v9 }
 0x376   :  { %v1323_v31 = vmul.f32 -1.442695, %v488_v18 }
 0x378   :  { %1423 = vpow2.f32 %v1323_v31  ;;  %v530_v12 = vpop.f32.mrf.mxu2 }
 0x379   :  { %1425 = vpow2.f32 %v1325_v30  ;;  %v531_v24 = vadd.f32 %v530_v12, %v2056_v10 }
 0x37a   :  { %v527_v32 = vpop.f32.mrf.mxu0 }
 0x37b   :  { %v489_v44 = vpop.f32.mrf.mxu3  ;;  %v1331_v52 = vmul.f32 -1.442695, %v531_v24  ;;  %v528_v43 = vadd.f32 %v527_v32, %v2054_v20 }
 0x37c   :  { %v490_v26 = vadd.f32 %v489_v44, %v2054_v20 }
 0x37d   :  { %1427 = vpow2.f32 %v1331_v52  ;;  %v1328_v60 = vmul.f32 -1.442695, %v528_v43 }
 0x37e   :  { %v1424_v34 = vpop.eup %1423  ;;  %v1326_v3 = vmul.f32 -1.442695, %v490_v26 }
 0x37f   :  { %v1426_v6 = vpop.eup %1425  ;;  %v571_v8 = vadd.f32 1.0, %v1424_v34 }
 0x380   :  { %v573_v49 = vadd.f32 1.0, %v1426_v6  ;;  %1429 = vpow2.f32 %v1326_v3  ;;  %v532_v59 = vpop.f32.mrf.mxu2 }
 0x381   :  { %1431 = vrcp.f32 %v571_v8  ;;  %v533_v13 = vadd.f32 %v532_v59, %v2061_v48  ;;  %v592_v33 = vand.u32 2147483647, %v571_v8  ;;  %vm588_vm5 = vweird.f32 %v571_v8 }
 0x382   :  { %1433 = vrcp.f32 %v573_v49  ;;  %v594_v55 = vand.u32 2147483648, %v571_v8  ;;  %v622_v53 = vand.u32 2147483647, %v573_v49  ;;  %vm618_vm6 = vweird.f32 %v573_v49 }
 0x383   :  { %1435 = vpow2.f32 %v1328_v60  ;;  %v492_v38 = vpop.f32.mrf.mxu3  ;;  %v1428_v56 = vpop.eup %1427  ;;  %v1334_v61 = vmul.f32 -1.442695, %v533_v13  ;;  %vm2075_vm8 = vcmp.eq.f32.partialorder %v592_v33, 8.507059e+37  ;;  %v624_v37 = vand.u32 2147483648, %v573_v49 }
 0x384   :  { %v493_v29 = vadd.f32 %v492_v38, %v2056_v10  ;;  %v2065_v41 = vadd.f32 1.0, %v1428_v56  ;;  %v595_v7 = vor.u32 1.1754944e-38, %v594_v55  ;;  %vm2081_vm10 = vcmp.eq.f32.partialorder %v622_v53, 8.507059e+37 }
 0x385   :  { %v625_v32 = vor.u32 1.1754944e-38, %v624_v37 }
 0x386   :  { %v1430_v51 = vpop.eup %1429  ;;  %1437 = vrcp.f32 %v2065_v41  ;;  %v1329_v63 = vmul.f32 -1.442695, %v493_v29  ;;  %v712_v31 = vand.u32 2147483647, %v2065_v41  ;;  %v714_v30 = vand.u32 2147483648, %v2065_v41 }
 0x387   :  { %v1432_v57 = vpop.eup %1431  ;;  %v2068_v40 = vadd.f32 1.0, %v1430_v51  ;;  %1439 = vpow2.f32 %v1334_v61  ;;  %vm708_vm13 = vweird.f32 %v2065_v41 }
 0x388   :  { %v1434_v0 = vpop.eup %1433  ;;  %v584_v35 = vmul.f32 %v1432_v57, %v571_v8  ;;  %v2070_v28 = vpop.f32.mrf.mxu2  ;;  %vm589_vm7 = vweird.f32 %v1432_v57  ;;  %vm2102_vm15 = vcmp.eq.f32.partialorder %v712_v31, 8.507059e+37  ;;  %v715_v38 = vor.u32 1.1754944e-38, %v714_v30 }
 0x389   :  { %v1436_v45 = vpop.eup %1435  ;;  %v614_v46 = vmul.f32 %v1434_v0, %v573_v49  ;;  %1441 = vrcp.f32 %v2068_v40  ;;  %vm619_vm9 = vweird.f32 %v1434_v0  ;;  %vm590_vm11 = vmor %vm588_vm5, %vm589_vm7  ;;  %v637_v29 = vand.u32 2147483647, %v2068_v40 }
 0x38a   :  { %v585_v47 = vsub.f32 1.0, %v584_v35  ;;  %v2073_v23 = vadd.f32 1.0, %v1436_v45  ;;  %1443 = vpow2.f32 %v1329_v63  ;;  %vm620_vm12 = vmor %vm618_vm6, %vm619_vm9  ;;  %vm633_vm2 = vweird.f32 %v2068_v40 }
 0x38b   :  { %v615_v2 = vsub.f32 1.0, %v614_v46  ;;  %v494_v50 = vpop.f32.mrf.mxu3  ;;  %vm638_vm6 = vcmp.eq.f32.partialorder %v637_v29, 8.507059e+37 }
 0x38c   :  { %v586_v36 = vmul.f32 %v1432_v57, %v585_v47  ;;  %v1438_v42 = vpop.eup %1437  ;;  %1445 = vrcp.f32 %v2073_v23  ;;  %v495_v58 = vadd.f32 %v494_v50, %v2061_v48  ;;  %v667_v33 = vand.u32 2147483647, %v2073_v23 }
 0x38d   :  { %v616_v4 = vmul.f32 %v1434_v0, %v615_v2  ;;  %v1440_v39 = vpop.eup %1439  ;;  %v704_v18 = vmul.f32 %v1438_v42, %v2065_v41  ;;  %vm709_vm14 = vweird.f32 %v1438_v42  ;;  %v669_v47 = vand.u32 2147483648, %v2073_v23 }
 0x38e   :  { %v587_v5 = vadd.f32 %v1432_v57, %v586_v36  ;;  %v2089_v12 = vadd.f32 1.0, %v1440_v39  ;;  %v1332_v6 = vmul.f32 -1.442695, %v495_v58  ;;  %vm710_vm0 = vmor %vm708_vm13, %vm709_vm14  ;;  %vm663_vm7 = vweird.f32 %v2073_v23 }
 0x38f   :  { %v617_v9 = vadd.f32 %v1434_v0, %v616_v4  ;;  %v1442_v24 = vpop.eup %1441  ;;  %v705_v52 = vsub.f32 1.0, %v704_v18 }
 0x390   :  { %v591_v44 = vsel %vm590_vm11, %v1432_v57, %v587_v5  ;;  %v1444_v26 = vpop.eup %1443  ;;  %v629_v3 = vmul.f32 %v1442_v24, %v2068_v40  ;;  %v2097_v8 = vpop.f32.mrf.mxu2  ;;  %1447 = vrcp.f32 %v2089_v12  ;;  %v639_v57 = vand.u32 2147483648, %v2068_v40 }
 0x391   :  { %v596_v43 = vsel %vm2075_vm8, %v595_v7, %v591_v44  ;;  %v621_v34 = vsel %vm620_vm12, %v1434_v0, %v617_v9  ;;  %v706_v49 = vmul.f32 %v1438_v42, %v705_v52  ;;  %v2109_v0 = vadd.f32 1.0, %v1444_v26 }
 0x392   :  { %763 = vst [vmem:[#allocation5] sm:$0xff] %v596_v43  ;;  %v626_v60 = vsel %vm2081_vm10, %v625_v32, %v621_v34  ;;  %v1446_v59 = vpop.eup %1445  ;;  %v630_v56 = vsub.f32 1.0, %v629_v3  ;;  %vm634_vm1 = vweird.f32 %v1442_v24  ;;  %1449 = vpow2.f32 %v1332_v6 }
 0x393   :  { %765 = vst [vmem:[#allocation5 + $0x10] sm:$0xff] %v626_v60  ;;  %v506_v61 = vpop.f32.mrf.mxu3  ;;  %v707_v51 = vadd.f32 %v1438_v42, %v706_v49  ;;  %v659_v63 = vmul.f32 %v1446_v59, %v2073_v23  ;;  %1451 = vrcp.f32 %v2109_v0  ;;  %vm635_vm3 = vmor %vm633_vm2, %vm634_vm1  ;;  %v640_v41 = vor.u32 1.1754944e-38, %v639_v57 }
 0x394   :  { %v631_v35 = vmul.f32 %v1442_v24, %v630_v56  ;;  %vm664_vm5 = vweird.f32 %v1446_v59  ;;  %v507_v36 = vadd.f32 %v506_v61, %v2050_v62  ;;  %vm668_vm8 = vcmp.eq.f32.partialorder %v667_v33, 8.507059e+37 }
 0x395   :  { %v711_v45 = vsel %vm710_vm0, %v1438_v42, %v707_v51  ;;  %v660_v46 = vsub.f32 1.0, %v659_v63  ;;  %v670_v40 = vor.u32 1.1754944e-38, %v669_v47  ;;  %vm665_vm9 = vmor %vm663_vm7, %vm664_vm5  ;;  %v757_v7 = vand.u32 2147483647, %v2089_v12 }
 0x396   :  { %v716_v55 = vsel %vm2102_vm15, %v715_v38, %v711_v45  ;;  %v632_v53 = vadd.f32 %v1442_v24, %v631_v35  ;;  %v1448_v2 = vpop.eup %1447  ;;  %v1324_v11 = vmul.f32 -1.442695, %v507_v36  ;;  %v759_v23 = vand.u32 2147483648, %v2089_v12 }
 0x397   :  { %771 = vst [vmem:[#allocation5 + $0x40] sm:$0xff] %v716_v55  ;;  %v661_v50 = vmul.f32 %v1446_v59, %v660_v46  ;;  %v749_v37 = vmul.f32 %v1448_v2, %v2089_v12  ;;  %vm754_vm10 = vweird.f32 %v1448_v2  ;;  %vm753_vm11 = vweird.f32 %v2089_v12 }
 0x398   :  { %v636_v25 = vsel %vm635_vm3, %v1442_v24, %v632_v53  ;;  %v2122_v42 = vpop.f32.mrf.mxu2  ;;  %v1450_v39 = vpop.eup %1449  ;;  %vm758_vm12 = vcmp.eq.f32.partialorder %v757_v7, 8.507059e+37  ;;  %vm755_vm13 = vmor %vm753_vm11, %vm754_vm10  ;;  %v760_v3 = vor.u32 1.1754944e-38, %v759_v23  ;;  %v684_v6 = vand.u32 2147483648, %v2109_v0 }
 0x399   :  { %v641_v4 = vsel %vm638_vm6, %v640_v41, %v636_v25  ;;  %v662_v58 = vadd.f32 %v1446_v59, %v661_v50  ;;  %v750_v5 = vsub.f32 1.0, %v749_v37  ;;  %v1452_v9 = vpop.eup %1451  ;;  %v2126_v30 = vadd.f32 1.0, %v1450_v39 }
 0x39a   :  { %766 = vst [vmem:[#allocation5 + $0x18] sm:$0xff] %v641_v4  ;;  %v674_v26 = vmul.f32 %v1452_v9, %v2109_v0  ;;  %vm679_vm14 = vweird.f32 %v1452_v9  ;;  %v682_v38 = vand.u32 2147483647, %v2109_v0  ;;  %vm678_vm15 = vweird.f32 %v2109_v0 }
 0x39b   :  { %v508_v18 = vpop.f32.mrf.mxu3  ;;  %v666_v31 = vsel %vm665_vm9, %v1446_v59, %v662_v58  ;;  %v973_v44 = vpop.f32.mrf.mxu0  ;;  %v751_v52 = vmul.f32 %v1448_v2, %v750_v5  ;;  %1453 = vrcp.f32 %v2126_v30  ;;  %vm680_vm0 = vmor %vm678_vm15, %vm679_vm14  ;;  %v685_v63 = vor.u32 1.1754944e-38, %v684_v6 }
 0x39c   :  { %v509_v24 = vadd.f32 %v508_v18, %v2054_v20  ;;  %v671_v32 = vsel %vm668_vm8, %v670_v40, %v666_v31  ;;  %v675_v34 = vsub.f32 1.0, %v674_v26  ;;  %1455 = vpow2.f32 %v1324_v11 }
 0x39d   :  { %768 = vst [vmem:[#allocation5 + $0x28] sm:$0xff] %v671_v32  ;;  %v752_v43 = vadd.f32 %v1448_v2, %v751_v52  ;;  %v974_v49 = vadd.f32 %v973_v44, %v2050_v62  ;;  %vm683_vm1 = vcmp.eq.f32.partialorder %v682_v38, 8.507059e+37  ;;  %v727_v25 = vand.u32 2147483647, %v2126_v30 }
 0x39e   :  { %v1327_v60 = vmul.f32 -1.442695, %v509_v24  ;;  %v676_v13 = vmul.f32 %v1452_v9, %v675_v34  ;;  %v729_v37 = vand.u32 2147483648, %v2126_v30  ;;  %vm723_vm3 = vweird.f32 %v2126_v30 }
 0x39f   :  { %v756_v59 = vsel %vm755_vm13, %v1448_v2, %v752_v43  ;;  %v1377_v29 = vmul.f32 -1.442695, %v974_v49  ;;  %vm728_vm6 = vcmp.eq.f32.partialorder %v727_v25, 8.507059e+37 }
 0x3a0   :  { %v2135_v56 = vpop.f32.mrf.mxu2  ;;  %v761_v12 = vsel %vm758_vm12, %v760_v3, %v756_v59  ;;  %1457 = vpow2.f32 %v1327_v60  ;;  %v677_v61 = vadd.f32 %v1452_v9, %v676_v13  ;;  %v730_v11 = vor.u32 1.1754944e-38, %v729_v37 }
 0x3a1   :  { %774 = vst [vmem:[#allocation5 + $0x58] sm:$0xff] %v761_v12  ;;  %v1454_v57 = vpop.eup %1453  ;;  %1459 = vpow2.f32 %v1377_v29 }
 0x3a2   :  { %v1456_v45 = vpop.eup %1455  ;;  %v681_v46 = vsel %vm680_vm0, %v1452_v9, %v677_v61  ;;  %v719_v47 = vmul.f32 %v1454_v57, %v2126_v30  ;;  %vm724_vm2 = vweird.f32 %v1454_v57 }
 0x3a3   :  { %v511_v51 = vpop.f32.mrf.mxu3  ;;  %v975_v33 = vpop.f32.mrf.mxu0  ;;  %v686_v53 = vsel %vm683_vm1, %v685_v63, %v681_v46  ;;  %v572_v2 = vadd.f32 1.0, %v1456_v45  ;;  %vm725_vm5 = vmor %vm723_vm3, %vm724_vm2 }
 0x3a4   :  { %v512_v35 = vadd.f32 %v511_v51, %v2056_v10  ;;  %v976_v55 = vadd.f32 %v975_v33, %v2054_v20  ;;  %769 = vst [vmem:[#allocation5 + $0x30] sm:$0xff] %v686_v53  ;;  %v720_v0 = vsub.f32 1.0, %v719_v47 }
 0x3a5   :  { %1461 = vrcp.f32 %v572_v2  ;;  %v607_v26 = vand.u32 2147483647, %v572_v2  ;;  %v609_v43 = vand.u32 2147483648, %v572_v2  ;;  %vm603_vm7 = vweird.f32 %v572_v2 }
 0x3a6   :  { %v1330_v41 = vmul.f32 -1.442695, %v512_v35  ;;  %v1380_v50 = vmul.f32 -1.442695, %v976_v55  ;;  %v1458_v36 = vpop.eup %1457  ;;  %v721_v4 = vmul.f32 %v1454_v57, %v720_v0 }
 0x3a7   :  { %v2143_v58 = vadd.f32 1.0, %v1458_v36  ;;  %v1460_v39 = vpop.eup %1459  ;;  %vm2167_vm9 = vcmp.eq.f32.partialorder %v607_v26, 8.507059e+37  ;;  %v610_v35 = vor.u32 1.1754944e-38, %v609_v43 }
 0x3a8   :  { %1463 = vpow2.f32 %v1330_v41  ;;  %v2145_v40 = vpop.f32.mrf.mxu2  ;;  %v722_v5 = vadd.f32 %v1454_v57, %v721_v4  ;;  %v2149_v18 = vadd.f32 1.0, %v1460_v39 }
 0x3a9   :  { %1465 = vpow2.f32 %v1380_v50  ;;  %v652_v38 = vand.u32 2147483647, %v2143_v58  ;;  %v654_v12 = vand.u32 2147483648, %v2143_v58  ;;  %vm648_vm10 = vweird.f32 %v2143_v58 }
 0x3aa   :  { %1467 = vrcp.f32 %v2143_v58  ;;  %v726_v9 = vsel %vm725_vm5, %v1454_v57, %v722_v5  ;;  %v1078_v55 = vand.u32 2147483647, %v2149_v18  ;;  %v1080_v0 = vand.u32 2147483648, %v2149_v18 }
 0x3ab   :  { %v513_v7 = vpop.f32.mrf.mxu3  ;;  %v978_v31 = vpop.f32.mrf.mxu0  ;;  %v731_v24 = vsel %vm728_vm6, %v730_v11, %v726_v9  ;;  %1469 = vrcp.f32 %v2149_v18  ;;  %vm2175_vm13 = vcmp.eq.f32.partialorder %v652_v38, 8.507059e+37  ;;  %v655_v36 = vor.u32 1.1754944e-38, %v654_v12 }
 0x3ac   :  { %v1462_v23 = vpop.eup %1461  ;;  %772 = vst [vmem:[#allocation5 + $0x48] sm:$0xff] %v731_v24  ;;  %v514_v52 = vadd.f32 %v513_v7, %v2061_v48  ;;  %v979_v3 = vadd.f32 %v978_v31, %v2056_v10  ;;  %vm1074_vm14 = vweird.f32 %v2149_v18  ;;  %vm2185_vm1 = vcmp.eq.f32.partialorder %v1078_v55, 8.507059e+37 }
 0x3ad   :  { %v599_v32 = vmul.f32 %v1462_v23, %v572_v2  ;;  %vm604_vm8 = vweird.f32 %v1462_v23  ;;  %v1081_v24 = vor.u32 1.1754944e-38, %v1080_v0 }
 0x3ae   :  { %v1464_v44 = vpop.eup %1463  ;;  %v1333_v61 = vmul.f32 -1.442695, %v514_v52  ;;  %v1383_v45 = vmul.f32 -1.442695, %v979_v3  ;;  %vm605_vm11 = vmor %vm603_vm7, %vm604_vm8 }
 0x3af   :  { %v1466_v30 = vpop.eup %1465  ;;  %v2153_v34 = vadd.f32 1.0, %v1464_v44  ;;  %v600_v60 = vsub.f32 1.0, %v599_v32 }
 0x3b0   :  { %v1468_v6 = vpop.eup %1467  ;;  %v2156_v49 = vadd.f32 1.0, %v1466_v30  ;;  %v2158_v59 = vpop.f32.mrf.mxu2 }
 0x3b1   :  { %v644_v13 = vmul.f32 %v1468_v6, %v2143_v58  ;;  %1471 = vrcp.f32 %v2153_v34  ;;  %v601_v29 = vmul.f32 %v1462_v23, %v600_v60  ;;  %v1470_v57 = vpop.eup %1469  ;;  %vm649_vm12 = vweird.f32 %v1468_v6 }
 0x3b2   :  { %1473 = vrcp.f32 %v2156_v49  ;;  %v1070_v47 = vmul.f32 %v1470_v57, %v2149_v18  ;;  %vm650_vm15 = vmor %vm648_vm10, %vm649_vm12  ;;  %vm1075_vm0 = vweird.f32 %v1470_v57  ;;  %vm693_vm2 = vweird.f32 %v2153_v34 }
 0x3b3   :  { %v2165_v51 = vpop.f32.mrf.mxu3  ;;  %v645_v33 = vsub.f32 1.0, %v644_v13  ;;  %v602_v46 = vadd.f32 %v1462_v23, %v601_v29  ;;  %1475 = vpow2.f32 %v1333_v61  ;;  %v980_v9 = vpop.f32.mrf.mxu0  ;;  %v697_v30 = vand.u32 2147483647, %v2153_v34  ;;  %vm1076_vm3 = vmor %vm1074_vm14, %vm1075_vm0 }
 0x3b4   :  { %v1071_v25 = vsub.f32 1.0, %v1070_v47  ;;  %1477 = vpow2.f32 %v1383_v45  ;;  %v699_v43 = vand.u32 2147483648, %v2153_v34  ;;  %v981_v60 = vadd.f32 %v980_v9, %v2061_v48 }
 0x3b5   :  { %v646_v53 = vmul.f32 %v1468_v6, %v645_v33  ;;  %v606_v50 = vsel %vm605_vm11, %v1462_v23, %v602_v46  ;;  %v1125_v29 = vand.u32 2147483648, %v2156_v49  ;;  %vm1119_vm7 = vweird.f32 %v2156_v49 }
 0x3b6   :  { %v611_v4 = vsel %vm2167_vm9, %v610_v35, %v606_v50  ;;  %v1072_v5 = vmul.f32 %v1470_v57, %v1071_v25  ;;  %v1386_v46 = vmul.f32 -1.442695, %v981_v60  ;;  %vm698_vm9 = vcmp.eq.f32.partialorder %v697_v30, 8.507059e+37 }
 0x3b7   :  { %v1472_v37 = vpop.eup %1471  ;;  %v647_v39 = vadd.f32 %v1468_v6, %v646_v53  ;;  %764 = vst [vmem:[#allocation5 + $0x8] sm:$0xff] %v611_v4  ;;  %v1126_v53 = vor.u32 1.1754944e-38, %v1125_v29  ;;  %v872_v50 = vadd.f32 %v2158_v59, %v1926_v19 }
 0x3b8   :  { %v1474_v2 = vpop.eup %1473  ;;  %v689_v11 = vmul.f32 %v1472_v37, %v2153_v34  ;;  %v874_v31 = vpop.f32.mrf.mxu2  ;;  %v1073_v32 = vadd.f32 %v1470_v57, %v1072_v5  ;;  %vm694_vm5 = vweird.f32 %v1472_v37 }
 0x3b9   :  { %v651_v23 = vsel %vm650_vm15, %v1468_v6, %v647_v39  ;;  %v1115_v44 = vmul.f32 %v1474_v2, %v2156_v49  ;;  %v1123_v6 = vand.u32 2147483647, %v2156_v49  ;;  %v1476_v13 = vpop.eup %1475  ;;  %vm1120_vm6 = vweird.f32 %v1474_v2  ;;  %vm695_vm8 = vmor %vm693_vm2, %vm694_vm5 }
 0x3ba   :  { %v656_v58 = vsel %vm2175_vm13, %v655_v36, %v651_v23  ;;  %v690_v52 = vsub.f32 1.0, %v689_v11  ;;  %v1077_v38 = vsel %vm1076_vm3, %v1470_v57, %v1073_v32  ;;  %v1478_v61 = vpop.eup %1477  ;;  %v2206_v18 = vadd.f32 1.0, %v1476_v13  ;;  %vm1121_vm10 = vmor %vm1119_vm7, %vm1120_vm6 }
 0x3bb   :  { %v2195_v26 = vpop.f32.mrf.mxu3  ;;  %767 = vst [vmem:[#allocation5 + $0x20] sm:$0xff] %v656_v58  ;;  %v1116_v3 = vsub.f32 1.0, %v1115_v44  ;;  %v1082_v63 = vsel %vm2185_vm1, %v1081_v24, %v1077_v38  ;;  %v2209_v45 = vadd.f32 1.0, %v1478_v61  ;;  %v700_v57 = vor.u32 1.1754944e-38, %v699_v43 }
 0x3bc   :  { %v691_v12 = vmul.f32 %v1472_v37, %v690_v52  ;;  %1250 = vst [vmem:[#allocation5 + $0x60] sm:$0xff] %v1082_v63  ;;  %1479 = vrcp.f32 %v2206_v18  ;;  %vm1124_vm11 = vcmp.eq.f32.partialorder %v1123_v6, 8.507059e+37  ;;  %v875_v34 = vadd.f32 %v874_v31, %v1920_v54 }
 0x3bd   :  { %v1117_v35 = vmul.f32 %v1474_v2, %v1116_v3  ;;  %1481 = vrcp.f32 %v2209_v45  ;;  %v867_v39 = vadd.f32 %v2135_v56, %v1928_v16  ;;  %v924_v5 = vmax.f32 %v872_v50, 0.0 }
 0x3be   :  { %v692_v33 = vadd.f32 %v1472_v37, %v691_v12  ;;  %1483 = vpow2.f32 %v1386_v46  ;;  %v927_v7 = vmax.f32 %v875_v34, 0.0  ;;  %v865_v58 = vadd.f32 %v2122_v42, %v1954_v1 }
 0x3bf   :  { %v1118_v47 = vadd.f32 %v1474_v2, %v1117_v35  ;;  %v918_v32 = vmax.f32 %v867_v39, 0.0  ;;  %v744_v52 = vand.u32 2147483648, %v2206_v18  ;;  %v742_v60 = vand.u32 2147483647, %v2206_v18 }
 0x3c0   :  { %v696_v55 = vsel %vm695_vm8, %v1472_v37, %v692_v33  ;;  %v876_v41 = vpop.f32.mrf.mxu2  ;;  %v870_v37 = vadd.f32 %v2145_v40, %v1922_v15  ;;  %v862_v40 = vadd.f32 %v2097_v8, %v1935_v22  ;;  %v1170_v13 = vand.u32 2147483648, %v2209_v45 }
 0x3c1   :  { %v701_v0 = vsel %vm698_vm9, %v700_v57, %v696_v55  ;;  %v1122_v49 = vsel %vm1121_vm10, %v1474_v2, %v1118_v47  ;;  %v877_v4 = vadd.f32 %v876_v41, %v1924_v14  ;;  %v1168_v8 = vand.u32 2147483647, %v2209_v45 }
 0x3c2   :  { %770 = vst [vmem:[#allocation5 + $0x38] sm:$0xff] %v701_v0  ;;  %v1127_v36 = vsel %vm1124_vm11, %v1126_v53, %v1122_v49  ;;  %v1480_v2 = vpop.eup %1479  ;;  %v921_v31 = vmax.f32 %v870_v37, 0.0  ;;  %v860_v42 = vadd.f32 %v2070_v28, %v1930_v27  ;;  %vm738_vm14 = vweird.f32 %v2206_v18 }
 0x3c3   :  { %v2218_v25 = vpop.f32.mrf.mxu3  ;;  %1253 = vst [vmem:[#allocation5 + $0x78] sm:$0xff] %v1127_v36  ;;  %v930_v59 = vmax.f32 %v877_v4, 0.0  ;;  %v1482_v11 = vpop.eup %1481  ;;  %v734_v9 = vmul.f32 %v1480_v2, %v2206_v18  ;;  %vm739_vm12 = vweird.f32 %v1480_v2  ;;  %v915_v61 = vmax.f32 %v865_v58, 0.0 }
 0x3c4   :  { %v1160_v23 = vmul.f32 %v1482_v11, %v2209_v45  ;;  %v1484_v44 = vpop.eup %1483  ;;  %v943_v43 = vpack.c.bf16 %v924_v5, %v921_v31  ;;  %vm1165_vm13 = vweird.f32 %v1482_v11  ;;  %vm740_vm15 = vmor %vm738_vm14, %vm739_vm12  ;;  %v745_v63 = vor.u32 1.1754944e-38, %v744_v52 }
 0x3c5   :  { %v946_v24 = vpack.c.bf16 %v930_v59, %v927_v7  ;;  %v735_v56 = vsub.f32 1.0, %v734_v9  ;;  %v1066_v3 = vadd.f32 1.0, %v1484_v44  ;;  %vm1164_vm0 = vweird.f32 %v2209_v45 }
 0x3c6   :  { %v1161_v30 = vsub.f32 1.0, %v1160_v23  ;;  %v912_v33 = vmax.f32 %v862_v40, 0.0  ;;  %vm743_vm1 = vcmp.eq.f32.partialorder %v742_v60, 8.507059e+37  ;;  %vm1166_vm2 = vmor %vm1164_vm0, %vm1165_vm13  ;;  %v1171_v57 = vor.u32 1.1754944e-38, %v1170_v13 }
 0x3c7   :  { %987 = vmatpush.bf16.msrb.mxu0 %v946_v24  ;;  %v736_v6 = vmul.f32 %v1480_v2, %v735_v56  ;;  %1485 = vrcp.f32 %v1066_v3  ;;  %v940_v47 = vpack.c.bf16 %v918_v32, %v915_v61  ;;  %vm1169_vm3 = vcmp.eq.f32.partialorder %v1168_v8, 8.507059e+37 }
 0x3c8   :  { %v1162_v12 = vmul.f32 %v1482_v11, %v1161_v30  ;;  %v909_v41 = vmax.f32 %v860_v42, 0.0  ;;  %v1215_v34 = vand.u32 2147483648, %v1066_v3  ;;  %v1213_v37 = vand.u32 2147483647, %v1066_v3 }
 0x3c9   :  { %v737_v29 = vadd.f32 %v1480_v2, %v736_v6  ;;  %vm1209_vm6 = vweird.f32 %v1066_v3  ;;  %v894_v52 = vadd.f32 %v2218_v25, %v1954_v1 }
 0x3ca   :  { %v1163_v35 = vadd.f32 %v1482_v11, %v1162_v12  ;;  %v937_v45 = vpack.c.bf16 %v912_v33, %v909_v41  ;;  %v1216_v39 = vor.u32 1.1754944e-38, %v1215_v34  ;;  %vm1214_vm8 = vcmp.eq.f32.partialorder %v1213_v37, 8.507059e+37 }
 0x3cb   :  { %v895_v38 = vpop.f32.mrf.mxu3  ;;  %988 = vmatpush.bf16.msrb.mxu0 %v943_v43  ;;  %v741_v46 = vsel %vm740_vm15, %v1480_v2, %v737_v29 }
 0x3cc   :  { %v746_v55 = vsel %vm743_vm1, %v745_v63, %v741_v46  ;;  %v1167_v53 = vsel %vm1166_vm2, %v1482_v11, %v1163_v35  ;;  %v896_v58 = vadd.f32 %v895_v38, %v1928_v16 }
 0x3cd   :  { %773 = vst [vmem:[#allocation5 + $0x50] sm:$0xff] %v746_v55  ;;  %v1172_v28 = vsel %vm1169_vm3, %v1171_v57, %v1167_v53  ;;  %v1486_v18 = vpop.eup %1485 }
 0x3ce   :  { %1256 = vst [vmem:[#allocation5 + $0x90] sm:$0xff] %v1172_v28  ;;  %v1205_v0 = vmul.f32 %v1486_v18, %v1066_v3  ;;  %vm1210_vm5 = vweird.f32 %v1486_v18  ;;  %v919_v43 = vmax.f32 %v896_v58, 0.0 }
 0x3cf   :  { %989 = vmatpush.bf16.msrb.mxu0 %v940_v47  ;;  %vm1211_vm7 = vmor %vm1209_vm6, %vm1210_vm5 }
 0x3d0   :  { %v1206_v50 = vsub.f32 1.0, %v1205_v0 }
 0x3d2   :  { %v1207_v36 = vmul.f32 %v1486_v18, %v1206_v50 }
 0x3d3   :  { %v898_v49 = vpop.f32.mrf.mxu3  ;;  %990 = vmatpush.bf16.msrb.mxu0 %v937_v45 }
 0x3d4   :  { %v1208_v4 = vadd.f32 %v1486_v18, %v1207_v36  ;;  %v899_v24 = vadd.f32 %v898_v49, %v1922_v15  ;;  %v916_v15 = vmax.f32 %v894_v52, 0.0 }
 0x3d6   :  { %1373 = vmatmul.msk.bf16.vlgmr.msrb.gmra.mxu0 %vm471_vm4, %v2026_v17  ;;  %v1212_v2 = vsel %vm1211_vm7, %v1486_v18, %v1208_v4  ;;  %v922_v30 = vmax.f32 %v899_v24, 0.0  ;;  %v941_v6 = vpack.c.bf16 %v919_v43, %v916_v15 }
 0x3d7   :  { %v1217_v7 = vsel %vm1214_vm8, %v1216_v39, %v1212_v2 }
 0x3d8   :  { %1259 = vst [vmem:[#allocation5 + $0xa8] sm:$0xff] %v1217_v7 }
 0x3db   :  { %v900_v5 = vpop.f32.mrf.mxu3 }
 0x3dc   :  { %v901_v31 = vadd.f32 %v900_v5, %v1926_v19 }
 0x3de   :  { %v925_v32 = vmax.f32 %v901_v31, 0.0 }
 0x3e0   :  { %v944_v19 = vpack.c.bf16 %v925_v32, %v922_v30 }
 0x3e3   :  { %v903_v59 = vpop.f32.mrf.mxu3 }
 0x3e4   :  { %v904_v11 = vadd.f32 %v903_v59, %v1920_v54  ;;  %v891_v54 = vadd.f32 %v2195_v26, %v1935_v22 }
 0x3e6   :  { %1374 = vmatmul.msk.bf16.gmra.mxu0 %vm471_vm4, %v2036_v21  ;;  %v928_v44 = vmax.f32 %v904_v11, 0.0  ;;  %v913_v3 = vmax.f32 %v891_v54, 0.0 }
 0x3eb   :  { %v905_v9 = vpop.f32.mrf.mxu3 }
 0x3ec   :  { %v906_v23 = vadd.f32 %v905_v9, %v1924_v14  ;;  %v889_v14 = vadd.f32 %v2165_v51, %v1930_v27 }
 0x3ee   :  { %v931_v40 = vmax.f32 %v906_v23, 0.0  ;;  %v910_v16 = vmax.f32 %v889_v14, 0.0 }
 0x3f0   :  { %v947_v56 = vpack.c.bf16 %v931_v40, %v928_v44  ;;  %v938_v60 = vpack.c.bf16 %v913_v3, %v910_v16 }
 0x3f2   :  { %1006 = vmatpush.bf16.msra.mxu1 %v947_v56 }
 0x3f6   :  { %1007 = vmatpush.bf16.msra.mxu1 %v944_v19 }
 0x3fa   :  { %1008 = vmatpush.bf16.msra.mxu1 %v941_v6 }
 0x3fe   :  { %1009 = vmatpush.bf16.msra.mxu1 %v938_v60 }
 0x401   :  { %1375 = vmatmul.msk.bf16.vlgmr.msra.gmra.mxu1 %vm471_vm4, %v2026_v17 }
 0x411   :  { %1376 = vmatmul.msk.bf16.gmra.mxu1 %vm471_vm4, %v2036_v21 }
 0x453   :  { %v992_v22 = vpop.f32.mrf.mxu0 }
 0x454   :  { %v993_v1 = vadd.f32 %v992_v22, %v2050_v62 }
 0x456   :  { %v1378_v26 = vmul.f32 -1.442695, %v993_v1 }
 0x458   :  { %1487 = vpow2.f32 %v1378_v26 }
 0x45b   :  { %v994_v27 = vpop.f32.mrf.mxu0 }
 0x45c   :  { %v995_v51 = vadd.f32 %v994_v27, %v2054_v20 }
 0x45e   :  { %v1488_v25 = vpop.eup %1487  ;;  %v1381_v13 = vmul.f32 -1.442695, %v995_v51 }
 0x45f   :  { %v1058_v38 = vadd.f32 1.0, %v1488_v25 }
 0x460   :  { %1489 = vpow2.f32 %v1381_v13 }
 0x461   :  { %1491 = vrcp.f32 %v1058_v38  ;;  %v1095_v35 = vand.u32 2147483648, %v1058_v38  ;;  %v1093_v57 = vand.u32 2147483647, %v1058_v38  ;;  %vm1089_vm9 = vweird.f32 %v1058_v38 }
 0x463   :  { %v997_v12 = vpop.f32.mrf.mxu0  ;;  %v1096_v41 = vor.u32 1.1754944e-38, %v1095_v35  ;;  %vm1094_vm11 = vcmp.eq.f32.partialorder %v1093_v57, 8.507059e+37 }
 0x464   :  { %v998_v8 = vadd.f32 %v997_v12, %v2056_v10 }
 0x466   :  { %v1490_v17 = vpop.eup %1489  ;;  %v1384_v42 = vmul.f32 -1.442695, %v998_v8 }
 0x467   :  { %v1492_v29 = vpop.eup %1491  ;;  %v1061_v21 = vadd.f32 1.0, %v1490_v17 }
 0x468   :  { %v1085_v61 = vmul.f32 %v1492_v29, %v1058_v38  ;;  %1493 = vpow2.f32 %v1384_v42  ;;  %vm1090_vm4 = vweird.f32 %v1492_v29 }
 0x469   :  { %1495 = vrcp.f32 %v1061_v21  ;;  %vm1091_vm10 = vmor %vm1089_vm9, %vm1090_vm4  ;;  %v1140_v36 = vand.u32 2147483648, %v1061_v21  ;;  %v1138_v4 = vand.u32 2147483647, %v1061_v21  ;;  %vm1134_vm13 = vweird.f32 %v1061_v21 }
 0x46a   :  { %v1086_v63 = vsub.f32 1.0, %v1085_v61 }
 0x46b   :  { %v999_v33 = vpop.f32.mrf.mxu0  ;;  %v1141_v7 = vor.u32 1.1754944e-38, %v1140_v36  ;;  %vm1139_vm15 = vcmp.eq.f32.partialorder %v1138_v4, 8.507059e+37 }
 0x46c   :  { %v1087_v46 = vmul.f32 %v1492_v29, %v1086_v63  ;;  %v1000_v47 = vadd.f32 %v999_v33, %v2061_v48 }
 0x46e   :  { %v1494_v55 = vpop.eup %1493  ;;  %v1088_v53 = vadd.f32 %v1492_v29, %v1087_v46  ;;  %v1387_v28 = vmul.f32 -1.442695, %v1000_v47 }
 0x46f   :  { %v1496_v18 = vpop.eup %1495  ;;  %v1064_v0 = vadd.f32 1.0, %v1494_v55 }
 0x470   :  { %v1092_v49 = vsel %vm1091_vm10, %v1492_v29, %v1088_v53  ;;  %v1130_v45 = vmul.f32 %v1496_v18, %v1061_v21  ;;  %1497 = vpow2.f32 %v1387_v28  ;;  %vm1135_vm12 = vweird.f32 %v1496_v18 }
 0x471   :  { %v1097_v50 = vsel %vm1094_vm11, %v1096_v41, %v1092_v49  ;;  %1499 = vrcp.f32 %v1064_v0  ;;  %vm1136_vm14 = vmor %vm1134_vm13, %vm1135_vm12  ;;  %v1185_v24 = vand.u32 2147483648, %v1064_v0  ;;  %v1183_v58 = vand.u32 2147483647, %v1064_v0 }
 0x472   :  { %1251 = vst [vmem:[#allocation5 + $0x68] sm:$0xff] %v1097_v50  ;;  %v1131_v34 = vsub.f32 1.0, %v1130_v45  ;;  %vm1179_vm1 = vweird.f32 %v1064_v0 }
 0x473   :  { %v1186_v54 = vor.u32 1.1754944e-38, %v1185_v24  ;;  %vm1184_vm3 = vcmp.eq.f32.partialorder %v1183_v58, 8.507059e+37 }
 0x474   :  { %v1132_v37 = vmul.f32 %v1496_v18, %v1131_v34 }
 0x476   :  { %v1498_v39 = vpop.eup %1497  ;;  %v1133_v2 = vadd.f32 %v1496_v18, %v1132_v37 }
 0x477   :  { %v1500_v5 = vpop.eup %1499  ;;  %v1067_v59 = vadd.f32 1.0, %v1498_v39 }
 0x478   :  { %v1137_v11 = vsel %vm1136_vm14, %v1496_v18, %v1133_v2  ;;  %v1175_v9 = vmul.f32 %v1500_v5, %v1064_v0  ;;  %vm1180_vm0 = vweird.f32 %v1500_v5 }
 0x479   :  { %v1142_v31 = vsel %vm1139_vm15, %v1141_v7, %v1137_v11  ;;  %1501 = vrcp.f32 %v1067_v59  ;;  %vm1181_vm2 = vmor %vm1179_vm1, %vm1180_vm0  ;;  %v1230_v3 = vand.u32 2147483648, %v1067_v59  ;;  %v1228_v60 = vand.u32 2147483647, %v1067_v59 }
 0x47a   :  { %1254 = vst [vmem:[#allocation5 + $0x80] sm:$0xff] %v1142_v31  ;;  %v1176_v23 = vsub.f32 1.0, %v1175_v9  ;;  %vm1224_vm6 = vweird.f32 %v1067_v59 }
 0x47b   :  { %v1231_v27 = vor.u32 1.1754944e-38, %v1230_v3  ;;  %vm1229_vm8 = vcmp.eq.f32.partialorder %v1228_v60, 8.507059e+37 }
 0x47c   :  { %v1177_v40 = vmul.f32 %v1500_v5, %v1176_v23 }
 0x47e   :  { %v1011_v44 = vpop.f32.mrf.mxu1  ;;  %v1178_v56 = vadd.f32 %v1500_v5, %v1177_v40 }
 0x47f   :  { %v1012_v32 = vadd.f32 %v1011_v44, %v2050_v62  ;;  %v1502_v30 = vpop.eup %1501 }
 0x480   :  { %v1182_v43 = vsel %vm1181_vm2, %v1500_v5, %v1178_v56  ;;  %v1220_v19 = vmul.f32 %v1502_v30, %v1067_v59  ;;  %vm1225_vm5 = vweird.f32 %v1502_v30 }
 0x481   :  { %v1379_v52 = vmul.f32 -1.442695, %v1012_v32  ;;  %v1187_v14 = vsel %vm1184_vm3, %v1186_v54, %v1182_v43  ;;  %vm1226_vm7 = vmor %vm1224_vm6, %vm1225_vm5 }
 0x482   :  { %1257 = vst [vmem:[#allocation5 + $0x98] sm:$0xff] %v1187_v14  ;;  %v1221_v15 = vsub.f32 1.0, %v1220_v19 }
 0x483   :  { %1503 = vpow2.f32 %v1379_v52 }
 0x484   :  { %v1222_v16 = vmul.f32 %v1502_v30, %v1221_v15 }
 0x486   :  { %v1013_v6 = vpop.f32.mrf.mxu1  ;;  %v1223_v1 = vadd.f32 %v1502_v30, %v1222_v16 }
 0x487   :  { %v1014_v62 = vadd.f32 %v1013_v6, %v2054_v20 }
 0x488   :  { %v1227_v25 = vsel %vm1226_vm7, %v1502_v30, %v1223_v1 }
 0x489   :  { %v1504_v22 = vpop.eup %1503  ;;  %v1382_v26 = vmul.f32 -1.442695, %v1014_v62  ;;  %v1232_v13 = vsel %vm1229_vm8, %v1231_v27, %v1227_v25 }
 0x48a   :  { %v1059_v51 = vadd.f32 1.0, %v1504_v22  ;;  %1260 = vst [vmem:[#allocation5 + $0xb0] sm:$0xff] %v1232_v13 }
 0x48b   :  { %1505 = vpow2.f32 %v1382_v26 }
 0x48c   :  { %1507 = vrcp.f32 %v1059_v51  ;;  %v1110_v61 = vand.u32 2147483648, %v1059_v51  ;;  %v1108_v33 = vand.u32 2147483647, %v1059_v51  ;;  %vm1104_vm9 = vweird.f32 %v1059_v51 }
 0x48e   :  { %v1016_v38 = vpop.f32.mrf.mxu1  ;;  %v1111_v53 = vor.u32 1.1754944e-38, %v1110_v61  ;;  %vm1109_vm11 = vcmp.eq.f32.partialorder %v1108_v33, 8.507059e+37 }
 0x48f   :  { %v1017_v12 = vadd.f32 %v1016_v38, %v2056_v10 }
 0x491   :  { %v1506_v8 = vpop.eup %1505  ;;  %v1385_v17 = vmul.f32 -1.442695, %v1017_v12 }
 0x492   :  { %v1508_v42 = vpop.eup %1507  ;;  %v1062_v20 = vadd.f32 1.0, %v1506_v8 }
 0x493   :  { %v1100_v29 = vmul.f32 %v1508_v42, %v1059_v51  ;;  %1509 = vpow2.f32 %v1385_v17  ;;  %vm1105_vm4 = vweird.f32 %v1508_v42 }
 0x494   :  { %1511 = vrcp.f32 %v1062_v20  ;;  %vm1106_vm10 = vmor %vm1104_vm9, %vm1105_vm4  ;;  %v1155_v45 = vand.u32 2147483648, %v1062_v20  ;;  %vm1149_vm13 = vweird.f32 %v1062_v20 }
 0x495   :  { %v1101_v21 = vsub.f32 1.0, %v1100_v29 }
 0x496   :  { %v1018_v63 = vpop.f32.mrf.mxu1  ;;  %v1156_v4 = vor.u32 1.1754944e-38, %v1155_v45 }
 0x497   :  { %v1102_v35 = vmul.f32 %v1508_v42, %v1101_v21  ;;  %v1019_v46 = vadd.f32 %v1018_v63, %v2061_v48  ;;  %v1153_v48 = vand.u32 2147483647, %v1062_v20 }
 0x499   :  { %v1510_v57 = vpop.eup %1509  ;;  %v1103_v47 = vadd.f32 %v1508_v42, %v1102_v35  ;;  %v1388_v55 = vmul.f32 -1.442695, %v1019_v46  ;;  %vm1154_vm15 = vcmp.eq.f32.partialorder %v1153_v48, 8.507059e+37 }
 0x49a   :  { %v1512_v10 = vpop.eup %1511  ;;  %v1065_v28 = vadd.f32 1.0, %v1510_v57 }
 0x49b   :  { %v1107_v18 = vsel %vm1106_vm10, %v1508_v42, %v1103_v47  ;;  %v1145_v41 = vmul.f32 %v1512_v10, %v1062_v20  ;;  %1513 = vpow2.f32 %v1388_v55  ;;  %vm1150_vm12 = vweird.f32 %v1512_v10 }
 0x49c   :  { %v1112_v0 = vsel %vm1109_vm11, %v1111_v53, %v1107_v18  ;;  %1515 = vrcp.f32 %v1065_v28  ;;  %vm1151_vm14 = vmor %vm1149_vm13, %vm1150_vm12  ;;  %v1200_v11 = vand.u32 2147483648, %v1065_v28  ;;  %v1198_v31 = vand.u32 2147483647, %v1065_v28 }
 0x49d   :  { %1252 = vst [vmem:[#allocation5 + $0x70] sm:$0xff] %v1112_v0  ;;  %v1146_v49 = vsub.f32 1.0, %v1145_v41  ;;  %vm1194_vm1 = vweird.f32 %v1065_v28 }
 0x49e   :  { %v1201_v44 = vor.u32 1.1754944e-38, %v1200_v11  ;;  %vm1199_vm3 = vcmp.eq.f32.partialorder %v1198_v31, 8.507059e+37 }
 0x49f   :  { %v1147_v50 = vmul.f32 %v1512_v10, %v1146_v49 }
 0x4a1   :  { %v1514_v34 = vpop.eup %1513  ;;  %v1148_v36 = vadd.f32 %v1512_v10, %v1147_v50 }
 0x4a2   :  { %v1516_v37 = vpop.eup %1515  ;;  %v1068_v39 = vadd.f32 1.0, %v1514_v34 }
 0x4a3   :  { %v1152_v2 = vsel %vm1151_vm14, %v1512_v10, %v1148_v36  ;;  %v1190_v5 = vmul.f32 %v1516_v37, %v1065_v28  ;;  %vm1195_vm0 = vweird.f32 %v1516_v37 }
 0x4a4   :  { %v1157_v7 = vsel %vm1154_vm15, %v1156_v4, %v1152_v2  ;;  %1517 = vrcp.f32 %v1068_v39  ;;  %vm1196_vm2 = vmor %vm1194_vm1, %vm1195_vm0  ;;  %v1245_v52 = vand.u32 2147483648, %v1068_v39  ;;  %v1243_v54 = vand.u32 2147483647, %v1068_v39 }
 0x4a5   :  { %1255 = vst [vmem:[#allocation5 + $0x88] sm:$0xff] %v1157_v7  ;;  %v1191_v59 = vsub.f32 1.0, %v1190_v5  ;;  %vm1239_vm6 = vweird.f32 %v1068_v39 }
 0x4a6   :  { %v1246_v19 = vor.u32 1.1754944e-38, %v1245_v52  ;;  %vm1244_vm8 = vcmp.eq.f32.partialorder %v1243_v54, 8.507059e+37 }
 0x4a7   :  { %v1192_v9 = vmul.f32 %v1516_v37, %v1191_v59 }
 0x4a9   :  { %v1193_v23 = vadd.f32 %v1516_v37, %v1192_v9 }
 0x4aa   :  { %v1518_v24 = vpop.eup %1517 }
 0x4ab   :  { %v1197_v40 = vsel %vm1196_vm2, %v1516_v37, %v1193_v23  ;;  %v1235_v58 = vmul.f32 %v1518_v24, %v1068_v39  ;;  %vm1240_vm5 = vweird.f32 %v1518_v24 }
 0x4ac   :  { %v1202_v32 = vsel %vm1199_vm3, %v1201_v44, %v1197_v40  ;;  %vm1241_vm7 = vmor %vm1239_vm6, %vm1240_vm5 }
 0x4ad   :  { %1258 = vst [vmem:[#allocation5 + $0xa0] sm:$0xff] %v1202_v32  ;;  %v1236_v56 = vsub.f32 1.0, %v1235_v58 }
 0x4af   :  { %v1237_v30 = vmul.f32 %v1518_v24, %v1236_v56 }
 0x4b1   :  { %v1238_v43 = vadd.f32 %v1518_v24, %v1237_v30 }
 0x4b3   :  { %v1242_v14 = vsel %vm1241_vm7, %v1518_v24, %v1238_v43 }
 0x4b4   :  { %v1247_v15 = vsel %vm1244_vm8, %v1246_v19, %v1242_v14 }
 0x4b5   :  { %1261 = vst [vmem:[#allocation5 + $0xb8] sm:$0xff] %v1247_v15 }
 0x4b6   :  { %1274 = dma.vmem_to_hbm [thread:$0]  %s1267_s27, 3072, %s1269_s30, [#allocation4], %s1572_s23, %s1572_s23, %s1573_s24  }
 0x4b7   :  { %1569 = dma.done.wait [#allocation4], 3072  }
 0x4b8   :  { %1570 = vsyncadd [#allocation4], 4294964224 }
 0x4b9   :  { %1279 = vsyncpa [#allocation3], 1 }
 0x4ba   :  { %1280 = vsyncpa [#allocation4], 1 }

</bundles_post_ra>
